<compile_context>
chip_gen: v6e
topology: v6e:2x2x1
jax: 0.10.0
libtpu: 0.0.40
codegen_flags: <defaults>
</compile_context>

<pallas_src>
import functools
import numpy as np

import jax
import jax.numpy as jnp
from jax.experimental import pallas as pl
from jax.experimental.pallas import tpu as pltpu

_FIX = float(1 << 24)     # fixed point (cycles mod 1) for per-chunk phase offsets
_ABFIX = float(1 << 30)   # fixed point for merge/random-phase coefficients (|v| < 2)


def _frac(x):
    # floor-mod by 1.0 (matches torch `% 1` for the non-negative values used here)
    return x - jnp.floor(x)


def _pick_chunk_rows(rows, max_rows=64):
    """Largest divisor of `rows` that is <= max_rows and (== rows or a multiple of 8)."""
    best = None
    for d in range(1, min(rows, max_rows) + 1):
        if rows % d == 0 and (d == rows or d % 8 == 0):
            best = d
    # TODO(synk): for pathological row counts with no small divisor this falls back to a
    # single chunk spanning the sequence (correct but serializes the time axis).
    return best if best is not None else rows


def _sine_gen_kernel(off_ref, ab_ref, f0_ref, wnoise_ref, triu_ref, tril_ref, out_ref, *,
                     sampling_rate, sine_amp, noise_std, voiced_threshold, dim):
    b = pl.program_id(0)
    c = pl.program_id(1)

    x = f0_ref[0]                                     # (R, 128) f32, row-major time
    rad = _frac(x * (1.0 / sampling_rate))            # fundamental increment, mod 1

    # ---- blocked prefix sum of the fundamental phase (exact mod-1 reformulation) ----
    # level 1: inclusive scan along the 128-lane axis via the hoisted upper-triangular
    # constant; exact bf16 hi/lo operand split keeps ~f32 accuracy on the MXU.
    hi = rad.astype(jnp.bfloat16)
    lo = (rad - hi.astype(jnp.float32)).astype(jnp.bfloat16)
    triu = triu_ref[...]                              # (128,128) bf16, U[i,j]=1 iff i<=j
    y = _frac(jnp.dot(hi, triu, preferred_element_type=jnp.float32) +
              jnp.dot(lo, triu, preferred_element_type=jnp.float32))          # (R,128)

    # level 2: exclusive scan of per-row totals across the R rows (tiny matmul).
    tot = _frac(jnp.sum(rad, axis=1, keepdims=True))                          # (R,1)
    thi = tot.astype(jnp.bfloat16)
    tlo = (tot - thi.astype(jnp.float32)).astype(jnp.bfloat16)
    tril = tril_ref[...]                              # (R,R) bf16, L[i,j]=1 iff j<i
    row_off = _frac(jnp.dot(tril, thi, preferred_element_type=jnp.float32) +
                    jnp.dot(tril, tlo, preferred_element_type=jnp.float32))   # (R,1)

    # chunk-level exclusive offset (mod 1), 2^-24 fixed point from SMEM
    chunk_off = off_ref[b, c].astype(jnp.float32) * (1.0 / _FIX)

    # fundamental phase, kept reduced to [0,1) so sine args stay small & accurate
    phi = _frac(chunk_off + row_off + y)                                      # (R,128)

    # ---- all harmonics from 2 transcendentals via angle-addition recurrence ----
    ang = phi * (2.0 * np.pi)
    s1 = jnp.sin(ang)
    c1 = jnp.cos(ang)

    acc = jnp.zeros_like(s1)
    s_k, c_k = s1, c1                                 # sin/cos of 2*pi*(k+1)*phi
    for k in range(dim):                              # dim is small & static: trace-time unroll
        a_k = ab_ref[b, k].astype(jnp.float32) * (1.0 / _ABFIX)         # w_k*cos(2*pi*r_k)
        b_k = ab_ref[b, dim + k].astype(jnp.float32) * (1.0 / _ABFIX)   # w_k*sin(2*pi*r_k)
        acc = acc + a_k * s_k + b_k * c_k
        if k + 1 < dim:
            s_k, c_k = s_k * c1 + c_k * s1, c_k * c1 - s_k * s1

    # ---- voiced/unvoiced gating, pre-reduced noise, tanh merge ----
    wnoise = wnoise_ref[0]                            # (R,128) f32 = sum_k w_k * noise_k
    uv = (x > voiced_threshold).astype(jnp.float32)
    namp = uv * noise_std + (1.0 - uv) * (sine_amp / 3.0)
    out_ref[0] = jnp.tanh(sine_amp * uv * acc + namp * wnoise).astype(out_ref.dtype)


def sine_generator(f0, rand_ini, noise, weight, *, sampling_rate, sine_amp=0.1,
                   noise_std=0.003, voiced_threshold=0.0, max_chunk_rows=64):
    """Pallas forward of refinegan.SineGenerator.

    f0:       (B, T, 1) f32, T % 128 == 0
    rand_ini: (B, dim)  f32, column 0 zeroed (the module's torch.rand draw)
    noise:    (B, T, dim) Gaussian noise (the module's torch.randn draw)
    weight:   (dim, 1)  transposed nn.Linear(dim, 1, bias=False) weight
    """
    B, T, _ = f0.shape
    dim = weight.shape[0]
    assert T % 128 == 0, "T must be a multiple of 128"
    Tr = T // 128
    R = _pick_chunk_rows(Tr, max_chunk_rows)
    n_chunks = Tr // R

    f0_blk = f0[..., 0].reshape(B, Tr, 128)

    # Exclusive per-chunk phase offsets (mod 1), computed hierarchically so every
    # partial sum stays small in f32; delivered as 2^-24 fixed point via scalar
    # prefetch so the time-chunk grid axis is fully parallel.
    rad = jnp.mod(f0[..., 0] / sampling_rate, 1.0).reshape(B, n_chunks, R, 128)
    row_sums = jnp.mod(jnp.sum(rad, axis=-1), 1.0)                  # (B, nc, R)
    chunk_sums = jnp.mod(jnp.sum(row_sums, axis=-1), 1.0)           # (B, nc)
    incl = jnp.cumsum(chunk_sums, axis=-1)
    chunk_off = jnp.mod(incl - chunk_sums, 1.0)                     # exclusive prefix
    off_i32 = jnp.round(chunk_off * _FIX).astype(jnp.int32)         # (B, nc)

    # Merge-weight / random-phase coefficients a_k = w_k*cos(2*pi*r_k),
    # b_k = w_k*sin(2*pi*r_k), packed as int32 fixed point for SMEM scalar prefetch.
    # (|w_k| < 2 always holds for a Linear(dim,1) init.)
    w = weight[:, 0].astype(jnp.float32)                            # (dim,)
    two_pi_r = rand_ini.astype(jnp.float32) * (2.0 * np.pi)         # (B, dim)
    ab = jnp.concatenate([w * jnp.cos(two_pi_r), w * jnp.sin(two_pi_r)], axis=-1)
    ab_i32 = jnp.round(ab * _ABFIX).astype(jnp.int32)               # (B, 2*dim)

    # Pre-reduce the noise against the merge weights (f32) -> single lane-dense channel.
    wnoise = jnp.einsum("btd,d->bt", noise.astype(jnp.float32), w).reshape(B, Tr, 128)

    # Hoisted scan constants (DMA'd once; block index never changes).
    ii = np.arange(128)
    triu = jnp.asarray((ii[:, None] <= ii[None, :]).astype(np.float32), dtype=jnp.bfloat16)
    rr = np.arange(R)
    tril = jnp.asarray((rr[None, :] < rr[:, None]).astype(np.float32), dtype=jnp.bfloat16)

    kernel = functools.partial(
        _sine_gen_kernel,
        sampling_rate=float(sampling_rate),
        sine_amp=float(sine_amp),
        noise_std=float(noise_std),
        voiced_threshold=float(voiced_threshold),
        dim=dim,
    )

    out_blk = pl.pallas_call(
        kernel,
        out_shape=jax.ShapeDtypeStruct((B, Tr, 128), f0.dtype),
        grid_spec=pltpu.PrefetchScalarGridSpec(
            num_scalar_prefetch=2,                                   # off_i32, ab_i32 -> SMEM
            grid=(B, n_chunks),
            in_specs=[
                pl.BlockSpec((1, R, 128), lambda b, c, off, ab: (b, c, 0)),   # f0
                pl.BlockSpec((1, R, 128), lambda b, c, off, ab: (b, c, 0)),   # pre-reduced noise
                pl.BlockSpec((128, 128), lambda b, c, off, ab: (0, 0)),       # upper-tri scan
                pl.BlockSpec((R, R), lambda b, c, off, ab: (0, 0)),           # strict-lower carry
            ],
            out_specs=pl.BlockSpec((1, R, 128), lambda b, c, off, ab: (b, c, 0)),
        ),
        compiler_params=pltpu.CompilerParams(
            dimension_semantics=("parallel", "parallel"),
            vmem_limit_bytes=32 * 1024 * 1024,
        ),
    )(off_i32, ab_i32, f0_blk, wnoise, triu, tril)

    return out_blk.reshape(B, T, 1)


def sine_generator_reference(f0, rand_ini, noise, weight, *, sampling_rate,
                             sine_amp=0.1, noise_std=0.003, voiced_threshold=0.0):
    """Direct jnp transcription of the PyTorch module (same explicit randomness)."""
    B, T, _ = f0.shape
    dim = weight.shape[0]
    mult = jnp.arange(1, dim + 1, dtype=f0.dtype)
    f0_buf = f0 * mult                                              # (B, T, dim)
    rad = jnp.mod(f0_buf / sampling_rate, 1.0)
    rad = rad.at[:, 0, :].add(rand_ini)
    tmp = jnp.mod(jnp.cumsum(rad, axis=1), 1.0)
    wrap = (tmp[:, 1:, :] - tmp[:, :-1, :]) < 0
    shift = jnp.concatenate(
        [jnp.zeros((B, 1, dim), f0.dtype), -wrap.astype(f0.dtype)], axis=1)
    sine = jnp.sin(jnp.cumsum(rad + shift, axis=1) * (2.0 * np.pi)) * sine_amp
    uv = (f0 > voiced_threshold).astype(f0.dtype)                   # (B, T, 1)
    namp = uv * noise_std + (1.0 - uv) * sine_amp / 3.0
    s = sine * uv + namp * noise
    merged = jnp.sum(s * weight[:, 0], axis=-1, keepdims=True)
    return jnp.tanh(merged)


if __name__ == "__main__":
    # samp_rate=16000, harmonic_num=8 -> dim=9, f0 shape (B, T, 1)
    B, T = 2, 4096
    harmonic_num = 8
    dim = harmonic_num + 1
    samp_rate = 16000

    key = jax.random.PRNGKey(0)
    k_f0, k_rand, k_noise, k_w, k_uv = jax.random.split(key, 5)

    # f0 track: voiced frames 100..400 Hz, some unvoiced (0 Hz) frames
    f0 = jax.random.uniform(k_f0, (B, T, 1), jnp.float32, minval=100.0, maxval=400.0)
    voiced = (jax.random.uniform(k_uv, (B, T, 1)) > 0.25).astype(jnp.float32)
    f0 = f0 * voiced

    # randomness drawn inside the PyTorch forward, generated deterministically here
    rand_ini = jax.random.uniform(k_rand, (B, dim), jnp.float32)
    rand_ini = rand_ini.at[:, 0].set(0.0)
    noise = jax.random.normal(k_noise, (B, T, dim), jnp.float32)

    # nn.Linear(dim, 1, bias=False) weight, stored transposed as (dim, 1)
    bound = 1.0 / np.sqrt(dim)
    weight = jax.random.uniform(k_w, (dim, 1), jnp.float32, minval=-bound, maxval=bound)

    out = sine_generator(f0, rand_ini, noise, weight, sampling_rate=samp_rate)
    jax.block_until_ready(out)
    assert out.shape == (B, T, 1) and out.dtype == jnp.float32

    ref = sine_generator_reference(f0, rand_ini, noise, weight, sampling_rate=samp_rate)
    ref = jax.block_until_ready(ref)
    max_err = float(jnp.max(jnp.abs(out - ref)))
    # exact mod-1 reformulation + f32 pre-reduced noise; agreement is ~1e-4
    assert max_err < 5e-3, f"max |kernel - reference| = {max_err}"
    print("KERNEL_OK")
</pallas_src>

<mosaic_0001>
module attributes {stable_mosaic.version = 11 : i64} {
  func.func @_sine_gen_kernel(%arg0: i32, %arg1: i32, %arg2: memref<2x1xi32, #tpu.memory_space<smem>>, %arg3: memref<2x18xi32, #tpu.memory_space<smem>>, %arg4: memref<1x32x128xf32, #tpu.memory_space<vmem>>, %arg5: memref<1x32x128xf32, #tpu.memory_space<vmem>>, %arg6: memref<128x128xbf16, #tpu.memory_space<vmem>>, %arg7: memref<32x32xbf16, #tpu.memory_space<vmem>>, %arg8: memref<1x32x128xf32, #tpu.memory_space<vmem>>) attributes {dimension_semantics = [#tpu.dimension_semantics<parallel>, #tpu.dimension_semantics<parallel>], iteration_bounds = array<i64: 2, 1>, scalar_prefetch = 2 : i64, scratch_operands = 0 : i64, tpu.core_type = #tpu.core_type<tc>, window_params = [{transform_indices = @transform_0, window_bounds = array<i64: 1, 32, 128>}, {transform_indices = @transform_1, window_bounds = array<i64: 1, 32, 128>}, {pipeline_mode = #tpu.pipeline_mode<synchronous>, transform_indices = @transform_2, window_bounds = array<i64: 128, 128>}, {pipeline_mode = #tpu.pipeline_mode<synchronous>, transform_indices = @transform_3, window_bounds = array<i64: 32, 32>}, {transform_indices = @transform_4, window_bounds = array<i64: 1, 32, 128>}]} {
    %c0 = arith.constant 0 : index
    %c0_0 = arith.constant 0 : index
    %c0_1 = arith.constant 0 : index
    %0 = vector.load %arg4[%c0, %c0_0, %c0_1] : memref<1x32x128xf32, #tpu.memory_space<vmem>>, vector<1x32x128xf32>
    %1 = vector.shape_cast %0 : vector<1x32x128xf32> to vector<32x128xf32>
    %cst = arith.constant 6.250000e-05 : f32
    %2 = vector.broadcast %cst : f32 to vector<32x128xf32>
    %3 = arith.mulf %1, %2 : vector<32x128xf32>
    %4 = math.floor %3 : vector<32x128xf32>
    %5 = arith.subf %3, %4 : vector<32x128xf32>
    %6 = arith.truncf %5 : vector<32x128xf32> to vector<32x128xbf16>
    %7 = arith.extf %6 : vector<32x128xbf16> to vector<32x128xf32>
    %8 = arith.subf %5, %7 : vector<32x128xf32>
    %9 = arith.truncf %8 : vector<32x128xf32> to vector<32x128xbf16>
    %c0_2 = arith.constant 0 : index
    %c0_3 = arith.constant 0 : index
    %10 = vector.load %arg6[%c0_2, %c0_3] : memref<128x128xbf16, #tpu.memory_space<vmem>>, vector<128x128xbf16>
    %cst_4 = arith.constant dense<0.000000e+00> : vector<32x128xf32>
    %11 = tpu.matmul %6, %10, %cst_4 {dimension_numbers = #tpu.dot_dimension_numbers<[1], [0], [0], [1], [0, 0, 1, 1], [], []>} : vector<32x128xbf16>, vector<128x128xbf16>, vector<32x128xf32> -> vector<32x128xf32>
    %cst_5 = arith.constant dense<0.000000e+00> : vector<32x128xf32>
    %12 = tpu.matmul %9, %10, %cst_5 {dimension_numbers = #tpu.dot_dimension_numbers<[1], [0], [0], [1], [0, 0, 1, 1], [], []>} : vector<32x128xbf16>, vector<128x128xbf16>, vector<32x128xf32> -> vector<32x128xf32>
    %13 = arith.addf %11, %12 : vector<32x128xf32>
    %14 = math.floor %13 : vector<32x128xf32>
    %15 = arith.subf %13, %14 : vector<32x128xf32>
    %cst_6 = arith.constant dense<0.000000e+00> : vector<32xf32>
    %16 = vector.multi_reduction <add>, %5, %cst_6 [1] : vector<32x128xf32> to vector<32xf32>
    %17 = vector.shape_cast %16 : vector<32xf32> to vector<32x1xf32>
    %18 = math.floor %17 : vector<32x1xf32>
    %19 = arith.subf %17, %18 : vector<32x1xf32>
    %20 = arith.truncf %19 : vector<32x1xf32> to vector<32x1xbf16>
    %21 = arith.extf %20 : vector<32x1xbf16> to vector<32x1xf32>
    %22 = arith.subf %19, %21 : vector<32x1xf32>
    %23 = arith.truncf %22 : vector<32x1xf32> to vector<32x1xbf16>
    %c0_7 = arith.constant 0 : index
    %c0_8 = arith.constant 0 : index
    %24 = vector.load %arg7[%c0_7, %c0_8] : memref<32x32xbf16, #tpu.memory_space<vmem>>, vector<32x32xbf16>
    %cst_9 = arith.constant dense<0.000000e+00> : vector<32x1xf32>
    %25 = tpu.matmul %24, %20, %cst_9 {dimension_numbers = #tpu.dot_dimension_numbers<[1], [0], [0], [1], [0, 0, 1, 1], [], []>} : vector<32x32xbf16>, vector<32x1xbf16>, vector<32x1xf32> -> vector<32x1xf32>
    %cst_10 = arith.constant dense<0.000000e+00> : vector<32x1xf32>
    %26 = tpu.matmul %24, %23, %cst_10 {dimension_numbers = #tpu.dot_dimension_numbers<[1], [0], [0], [1], [0, 0, 1, 1], [], []>} : vector<32x32xbf16>, vector<32x1xbf16>, vector<32x1xf32> -> vector<32x1xf32>
    %27 = arith.addf %25, %26 : vector<32x1xf32>
    %28 = math.floor %27 : vector<32x1xf32>
    %29 = arith.subf %27, %28 : vector<32x1xf32>
    %30 = arith.index_cast %arg0 : i32 to index
    %31 = arith.index_cast %arg1 : i32 to index
    %32 = memref.load %arg2[%30, %31] : memref<2x1xi32, #tpu.memory_space<smem>>
    %33 = arith.sitofp %32 : i32 to f32
    %cst_11 = arith.constant 5.96046448E-8 : f32
    %34 = arith.mulf %33, %cst_11 : f32
    %35 = vector.broadcast %34 : f32 to vector<32x1xf32>
    %36 = arith.addf %35, %29 : vector<32x1xf32>
    %37 = vector.broadcast %36 : vector<32x1xf32> to vector<32x128xf32>
    %38 = arith.addf %37, %15 : vector<32x128xf32>
    %39 = math.floor %38 : vector<32x128xf32>
    %40 = arith.subf %38, %39 : vector<32x128xf32>
    %cst_12 = arith.constant 6.28318548 : f32
    %41 = vector.broadcast %cst_12 : f32 to vector<32x128xf32>
    %42 = arith.mulf %40, %41 : vector<32x128xf32>
    %43 = math.sin %42 : vector<32x128xf32>
    %44 = math.cos %42 : vector<32x128xf32>
    %cst_13 = arith.constant 0.000000e+00 : f32
    %45 = vector.broadcast %cst_13 : f32 to vector<32x128xf32>
    %46 = arith.index_cast %arg0 : i32 to index
    %c0_14 = arith.constant 0 : index
    %47 = memref.load %arg3[%46, %c0_14] : memref<2x18xi32, #tpu.memory_space<smem>>
    %48 = arith.sitofp %47 : i32 to f32
    %cst_15 = arith.constant 9.31322574E-10 : f32
    %49 = arith.mulf %48, %cst_15 : f32
    %50 = arith.index_cast %arg0 : i32 to index
    %c9 = arith.constant 9 : index
    %51 = memref.load %arg3[%50, %c9] : memref<2x18xi32, #tpu.memory_space<smem>>
    %52 = arith.sitofp %51 : i32 to f32
    %cst_16 = arith.constant 9.31322574E-10 : f32
    %53 = arith.mulf %52, %cst_16 : f32
    %54 = vector.broadcast %49 : f32 to vector<32x128xf32>
    %55 = arith.mulf %54, %43 : vector<32x128xf32>
    %56 = arith.addf %45, %55 : vector<32x128xf32>
    %57 = vector.broadcast %53 : f32 to vector<32x128xf32>
    %58 = arith.mulf %57, %44 : vector<32x128xf32>
    %59 = arith.addf %56, %58 : vector<32x128xf32>
    %60 = arith.mulf %43, %44 : vector<32x128xf32>
    %61 = arith.mulf %44, %43 : vector<32x128xf32>
    %62 = arith.addf %60, %61 : vector<32x128xf32>
    %63 = arith.mulf %44, %44 : vector<32x128xf32>
    %64 = arith.mulf %43, %43 : vector<32x128xf32>
    %65 = arith.subf %63, %64 : vector<32x128xf32>
    %66 = arith.index_cast %arg0 : i32 to index
    %c1 = arith.constant 1 : index
    %67 = memref.load %arg3[%66, %c1] : memref<2x18xi32, #tpu.memory_space<smem>>
    %68 = arith.sitofp %67 : i32 to f32
    %cst_17 = arith.constant 9.31322574E-10 : f32
    %69 = arith.mulf %68, %cst_17 : f32
    %70 = arith.index_cast %arg0 : i32 to index
    %c10 = arith.constant 10 : index
    %71 = memref.load %arg3[%70, %c10] : memref<2x18xi32, #tpu.memory_space<smem>>
    %72 = arith.sitofp %71 : i32 to f32
    %cst_18 = arith.constant 9.31322574E-10 : f32
    %73 = arith.mulf %72, %cst_18 : f32
    %74 = vector.broadcast %69 : f32 to vector<32x128xf32>
    %75 = arith.mulf %74, %62 : vector<32x128xf32>
    %76 = arith.addf %59, %75 : vector<32x128xf32>
    %77 = vector.broadcast %73 : f32 to vector<32x128xf32>
    %78 = arith.mulf %77, %65 : vector<32x128xf32>
    %79 = arith.addf %76, %78 : vector<32x128xf32>
    %80 = arith.mulf %62, %44 : vector<32x128xf32>
    %81 = arith.mulf %65, %43 : vector<32x128xf32>
    %82 = arith.addf %80, %81 : vector<32x128xf32>
    %83 = arith.mulf %65, %44 : vector<32x128xf32>
    %84 = arith.mulf %62, %43 : vector<32x128xf32>
    %85 = arith.subf %83, %84 : vector<32x128xf32>
    %86 = arith.index_cast %arg0 : i32 to index
    %c2 = arith.constant 2 : index
    %87 = memref.load %arg3[%86, %c2] : memref<2x18xi32, #tpu.memory_space<smem>>
    %88 = arith.sitofp %87 : i32 to f32
    %cst_19 = arith.constant 9.31322574E-10 : f32
    %89 = arith.mulf %88, %cst_19 : f32
    %90 = arith.index_cast %arg0 : i32 to index
    %c11 = arith.constant 11 : index
    %91 = memref.load %arg3[%90, %c11] : memref<2x18xi32, #tpu.memory_space<smem>>
    %92 = arith.sitofp %91 : i32 to f32
    %cst_20 = arith.constant 9.31322574E-10 : f32
    %93 = arith.mulf %92, %cst_20 : f32
    %94 = vector.broadcast %89 : f32 to vector<32x128xf32>
    %95 = arith.mulf %94, %82 : vector<32x128xf32>
    %96 = arith.addf %79, %95 : vector<32x128xf32>
    %97 = vector.broadcast %93 : f32 to vector<32x128xf32>
    %98 = arith.mulf %97, %85 : vector<32x128xf32>
    %99 = arith.addf %96, %98 : vector<32x128xf32>
    %100 = arith.mulf %82, %44 : vector<32x128xf32>
    %101 = arith.mulf %85, %43 : vector<32x128xf32>
    %102 = arith.addf %100, %101 : vector<32x128xf32>
    %103 = arith.mulf %85, %44 : vector<32x128xf32>
    %104 = arith.mulf %82, %43 : vector<32x128xf32>
    %105 = arith.subf %103, %104 : vector<32x128xf32>
    %106 = arith.index_cast %arg0 : i32 to index
    %c3 = arith.constant 3 : index
    %107 = memref.load %arg3[%106, %c3] : memref<2x18xi32, #tpu.memory_space<smem>>
    %108 = arith.sitofp %107 : i32 to f32
    %cst_21 = arith.constant 9.31322574E-10 : f32
    %109 = arith.mulf %108, %cst_21 : f32
    %110 = arith.index_cast %arg0 : i32 to index
    %c12 = arith.constant 12 : index
    %111 = memref.load %arg3[%110, %c12] : memref<2x18xi32, #tpu.memory_space<smem>>
    %112 = arith.sitofp %111 : i32 to f32
    %cst_22 = arith.constant 9.31322574E-10 : f32
    %113 = arith.mulf %112, %cst_22 : f32
    %114 = vector.broadcast %109 : f32 to vector<32x128xf32>
    %115 = arith.mulf %114, %102 : vector<32x128xf32>
    %116 = arith.addf %99, %115 : vector<32x128xf32>
    %117 = vector.broadcast %113 : f32 to vector<32x128xf32>
    %118 = arith.mulf %117, %105 : vector<32x128xf32>
    %119 = arith.addf %116, %118 : vector<32x128xf32>
    %120 = arith.mulf %102, %44 : vector<32x128xf32>
    %121 = arith.mulf %105, %43 : vector<32x128xf32>
    %122 = arith.addf %120, %121 : vector<32x128xf32>
    %123 = arith.mulf %105, %44 : vector<32x128xf32>
    %124 = arith.mulf %102, %43 : vector<32x128xf32>
    %125 = arith.subf %123, %124 : vector<32x128xf32>
    %126 = arith.index_cast %arg0 : i32 to index
    %c4 = arith.constant 4 : index
    %127 = memref.load %arg3[%126, %c4] : memref<2x18xi32, #tpu.memory_space<smem>>
    %128 = arith.sitofp %127 : i32 to f32
    %cst_23 = arith.constant 9.31322574E-10 : f32
    %129 = arith.mulf %128, %cst_23 : f32
    %130 = arith.index_cast %arg0 : i32 to index
    %c13 = arith.constant 13 : index
    %131 = memref.load %arg3[%130, %c13] : memref<2x18xi32, #tpu.memory_space<smem>>
    %132 = arith.sitofp %131 : i32 to f32
    %cst_24 = arith.constant 9.31322574E-10 : f32
    %133 = arith.mulf %132, %cst_24 : f32
    %134 = vector.broadcast %129 : f32 to vector<32x128xf32>
    %135 = arith.mulf %134, %122 : vector<32x128xf32>
    %136 = arith.addf %119, %135 : vector<32x128xf32>
    %137 = vector.broadcast %133 : f32 to vector<32x128xf32>
    %138 = arith.mulf %137, %125 : vector<32x128xf32>
    %139 = arith.addf %136, %138 : vector<32x128xf32>
    %140 = arith.mulf %122, %44 : vector<32x128xf32>
    %141 = arith.mulf %125, %43 : vector<32x128xf32>
    %142 = arith.addf %140, %141 : vector<32x128xf32>
    %143 = arith.mulf %125, %44 : vector<32x128xf32>
    %144 = arith.mulf %122, %43 : vector<32x128xf32>
    %145 = arith.subf %143, %144 : vector<32x128xf32>
    %146 = arith.index_cast %arg0 : i32 to index
    %c5 = arith.constant 5 : index
    %147 = memref.load %arg3[%146, %c5] : memref<2x18xi32, #tpu.memory_space<smem>>
    %148 = arith.sitofp %147 : i32 to f32
    %cst_25 = arith.constant 9.31322574E-10 : f32
    %149 = arith.mulf %148, %cst_25 : f32
    %150 = arith.index_cast %arg0 : i32 to index
    %c14 = arith.constant 14 : index
    %151 = memref.load %arg3[%150, %c14] : memref<2x18xi32, #tpu.memory_space<smem>>
    %152 = arith.sitofp %151 : i32 to f32
    %cst_26 = arith.constant 9.31322574E-10 : f32
    %153 = arith.mulf %152, %cst_26 : f32
    %154 = vector.broadcast %149 : f32 to vector<32x128xf32>
    %155 = arith.mulf %154, %142 : vector<32x128xf32>
    %156 = arith.addf %139, %155 : vector<32x128xf32>
    %157 = vector.broadcast %153 : f32 to vector<32x128xf32>
    %158 = arith.mulf %157, %145 : vector<32x128xf32>
    %159 = arith.addf %156, %158 : vector<32x128xf32>
    %160 = arith.mulf %142, %44 : vector<32x128xf32>
    %161 = arith.mulf %145, %43 : vector<32x128xf32>
    %162 = arith.addf %160, %161 : vector<32x128xf32>
    %163 = arith.mulf %145, %44 : vector<32x128xf32>
    %164 = arith.mulf %142, %43 : vector<32x128xf32>
    %165 = arith.subf %163, %164 : vector<32x128xf32>
    %166 = arith.index_cast %arg0 : i32 to index
    %c6 = arith.constant 6 : index
    %167 = memref.load %arg3[%166, %c6] : memref<2x18xi32, #tpu.memory_space<smem>>
    %168 = arith.sitofp %167 : i32 to f32
    %cst_27 = arith.constant 9.31322574E-10 : f32
    %169 = arith.mulf %168, %cst_27 : f32
    %170 = arith.index_cast %arg0 : i32 to index
    %c15 = arith.constant 15 : index
    %171 = memref.load %arg3[%170, %c15] : memref<2x18xi32, #tpu.memory_space<smem>>
    %172 = arith.sitofp %171 : i32 to f32
    %cst_28 = arith.constant 9.31322574E-10 : f32
    %173 = arith.mulf %172, %cst_28 : f32
    %174 = vector.broadcast %169 : f32 to vector<32x128xf32>
    %175 = arith.mulf %174, %162 : vector<32x128xf32>
    %176 = arith.addf %159, %175 : vector<32x128xf32>
    %177 = vector.broadcast %173 : f32 to vector<32x128xf32>
    %178 = arith.mulf %177, %165 : vector<32x128xf32>
    %179 = arith.addf %176, %178 : vector<32x128xf32>
    %180 = arith.mulf %162, %44 : vector<32x128xf32>
    %181 = arith.mulf %165, %43 : vector<32x128xf32>
    %182 = arith.addf %180, %181 : vector<32x128xf32>
    %183 = arith.mulf %165, %44 : vector<32x128xf32>
    %184 = arith.mulf %162, %43 : vector<32x128xf32>
    %185 = arith.subf %183, %184 : vector<32x128xf32>
    %186 = arith.index_cast %arg0 : i32 to index
    %c7 = arith.constant 7 : index
    %187 = memref.load %arg3[%186, %c7] : memref<2x18xi32, #tpu.memory_space<smem>>
    %188 = arith.sitofp %187 : i32 to f32
    %cst_29 = arith.constant 9.31322574E-10 : f32
    %189 = arith.mulf %188, %cst_29 : f32
    %190 = arith.index_cast %arg0 : i32 to index
    %c16 = arith.constant 16 : index
    %191 = memref.load %arg3[%190, %c16] : memref<2x18xi32, #tpu.memory_space<smem>>
    %192 = arith.sitofp %191 : i32 to f32
    %cst_30 = arith.constant 9.31322574E-10 : f32
    %193 = arith.mulf %192, %cst_30 : f32
    %194 = vector.broadcast %189 : f32 to vector<32x128xf32>
    %195 = arith.mulf %194, %182 : vector<32x128xf32>
    %196 = arith.addf %179, %195 : vector<32x128xf32>
    %197 = vector.broadcast %193 : f32 to vector<32x128xf32>
    %198 = arith.mulf %197, %185 : vector<32x128xf32>
    %199 = arith.addf %196, %198 : vector<32x128xf32>
    %200 = arith.mulf %182, %44 : vector<32x128xf32>
    %201 = arith.mulf %185, %43 : vector<32x128xf32>
    %202 = arith.addf %200, %201 : vector<32x128xf32>
    %203 = arith.mulf %185, %44 : vector<32x128xf32>
    %204 = arith.mulf %182, %43 : vector<32x128xf32>
    %205 = arith.subf %203, %204 : vector<32x128xf32>
    %206 = arith.index_cast %arg0 : i32 to index
    %c8 = arith.constant 8 : index
    %207 = memref.load %arg3[%206, %c8] : memref<2x18xi32, #tpu.memory_space<smem>>
    %208 = arith.sitofp %207 : i32 to f32
    %cst_31 = arith.constant 9.31322574E-10 : f32
    %209 = arith.mulf %208, %cst_31 : f32
    %210 = arith.index_cast %arg0 : i32 to index
    %c17 = arith.constant 17 : index
    %211 = memref.load %arg3[%210, %c17] : memref<2x18xi32, #tpu.memory_space<smem>>
    %212 = arith.sitofp %211 : i32 to f32
    %cst_32 = arith.constant 9.31322574E-10 : f32
    %213 = arith.mulf %212, %cst_32 : f32
    %214 = vector.broadcast %209 : f32 to vector<32x128xf32>
    %215 = arith.mulf %214, %202 : vector<32x128xf32>
    %216 = arith.addf %199, %215 : vector<32x128xf32>
    %217 = vector.broadcast %213 : f32 to vector<32x128xf32>
    %218 = arith.mulf %217, %205 : vector<32x128xf32>
    %219 = arith.addf %216, %218 : vector<32x128xf32>
    %c0_33 = arith.constant 0 : index
    %c0_34 = arith.constant 0 : index
    %c0_35 = arith.constant 0 : index
    %220 = vector.load %arg5[%c0_33, %c0_34, %c0_35] : memref<1x32x128xf32, #tpu.memory_space<vmem>>, vector<1x32x128xf32>
    %221 = vector.shape_cast %220 : vector<1x32x128xf32> to vector<32x128xf32>
    %cst_36 = arith.constant 0.000000e+00 : f32
    %222 = vector.broadcast %cst_36 : f32 to vector<32x128xf32>
    %223 = arith.cmpf ogt, %1, %222 : vector<32x128xf32>
    %224 = arith.extui %223 : vector<32x128xi1> to vector<32x128xi32>
    %225 = arith.sitofp %224 : vector<32x128xi32> to vector<32x128xf32>
    %cst_37 = arith.constant 3.000000e-03 : f32
    %226 = vector.broadcast %cst_37 : f32 to vector<32x128xf32>
    %227 = arith.mulf %225, %226 : vector<32x128xf32>
    %cst_38 = arith.constant 1.000000e+00 : f32
    %228 = vector.broadcast %cst_38 : f32 to vector<32x128xf32>
    %229 = arith.subf %228, %225 : vector<32x128xf32>
    %cst_39 = arith.constant 0.0333333351 : f32
    %230 = vector.broadcast %cst_39 : f32 to vector<32x128xf32>
    %231 = arith.mulf %229, %230 : vector<32x128xf32>
    %232 = arith.addf %227, %231 : vector<32x128xf32>
    %cst_40 = arith.constant 1.000000e-01 : f32
    %233 = vector.broadcast %cst_40 : f32 to vector<32x128xf32>
    %234 = arith.mulf %233, %225 : vector<32x128xf32>
    %235 = arith.mulf %234, %219 : vector<32x128xf32>
    %236 = arith.mulf %232, %221 : vector<32x128xf32>
    %237 = arith.addf %235, %236 : vector<32x128xf32>
    %238 = math.tanh %237 : vector<32x128xf32>
    %c0_41 = arith.constant 0 : index
    %c0_42 = arith.constant 0 : index
    %c0_43 = arith.constant 0 : index
    %239 = vector.load %arg8[%c0_41, %c0_42, %c0_43] : memref<1x32x128xf32, #tpu.memory_space<vmem>>, vector<1x32x128xf32>
    %240 = vector.shape_cast %239 : vector<1x32x128xf32> to vector<32x128xf32>
    %241 = vector.shape_cast %238 : vector<32x128xf32> to vector<1x32x128xf32>
    tpu.vector_store %arg8[%c0_41, %c0_42, %c0_43], %241 {strides = array<i32>} : memref<1x32x128xf32, #tpu.memory_space<vmem>>, vector<1x32x128xf32>,
    return
  }
  func.func @transform_0(%arg0: i32, %arg1: i32, %arg2: memref<2x1xi32, #tpu.memory_space<smem>>, %arg3: memref<2x18xi32, #tpu.memory_space<smem>>) -> (i32, i32, i32) {
    %c0_i32 = arith.constant 0 : i32
    %c0_i32_0 = arith.constant 0 : i32
    return %arg0, %arg1, %c0_i32 : i32, i32, i32
  }
  func.func @transform_1(%arg0: i32, %arg1: i32, %arg2: memref<2x1xi32, #tpu.memory_space<smem>>, %arg3: memref<2x18xi32, #tpu.memory_space<smem>>) -> (i32, i32, i32) {
    %c0_i32 = arith.constant 0 : i32
    %c0_i32_0 = arith.constant 0 : i32
    return %arg0, %arg1, %c0_i32 : i32, i32, i32
  }
  func.func @transform_2(%arg0: i32, %arg1: i32, %arg2: memref<2x1xi32, #tpu.memory_space<smem>>, %arg3: memref<2x18xi32, #tpu.memory_space<smem>>) -> (i32, i32) {
    %c0_i32 = arith.constant 0 : i32
    %c0_i32_0 = arith.constant 0 : i32
    %c0_i32_1 = arith.constant 0 : i32
    return %c0_i32, %c0_i32_0 : i32, i32
  }
  func.func @transform_3(%arg0: i32, %arg1: i32, %arg2: memref<2x1xi32, #tpu.memory_space<smem>>, %arg3: memref<2x18xi32, #tpu.memory_space<smem>>) -> (i32, i32) {
    %c0_i32 = arith.constant 0 : i32
    %c0_i32_0 = arith.constant 0 : i32
    %c0_i32_1 = arith.constant 0 : i32
    return %c0_i32, %c0_i32_0 : i32, i32
  }
  func.func @transform_4(%arg0: i32, %arg1: i32, %arg2: memref<2x1xi32, #tpu.memory_space<smem>>, %arg3: memref<2x18xi32, #tpu.memory_space<smem>>) -> (i32, i32, i32) {
    %c0_i32 = arith.constant 0 : i32
    %c0_i32_0 = arith.constant 0 : i32
    return %arg0, %arg1, %c0_i32 : i32, i32, i32
  }
}

</mosaic_0001>

<bundles_post_ra>
// kernel: tpu_custom_call.1
= control target key start
LH: loop header
LB: loop body
LE: loop exit
PB: predicated region body
PF: predicated region fallthrough
CT: control target
= control target key end

     0   :  { %s3949_s0 = inlined_call_operand.vmem [shape: s32[2,1], index: 0, kind: input, shape index: {}]   ;;  %s3950_s2 = inlined_call_operand.hbm [shape: f32[2,32,128], index: 2, kind: input, shape index: {}]   ;;  %s3951_s3 = inlined_call_operand.hbm [shape: f32[2,32,128], index: 3, kind: input, shape index: {}]   ;;  %s3952_s4 = inlined_call_operand.hbm [shape: bf16[128,128], index: 4, kind: input, shape index: {}]   ;;  %s3953_s5 = inlined_call_operand.hbm [shape: bf16[32,32], index: 5, kind: input, shape index: {}]   ;;  %s3954_s6 = inlined_call_operand.hbm [shape: f32[2,32,128], index: 6, kind: output, shape index: {}]   ;;  %s3955_s1 = inlined_call_operand.vmem [shape: s32[2,18], index: 1, kind: input, shape index: {}]  }
   0x1   :  { %3958 = sst [smem:[#allocation22_spill]] %s3950_s2  ;;  %s11_s23 = sshll.u32 %s3949_s0, 4  ;;  %s12_s23 = int_to_ptr.vmem [resolvable:$true] %s11_s23 }
   0x2   :  { %3959 = sst [smem:[#allocation23_spill]] %s3952_s4  ;;  %s15_s26 = sshll.u32 %s3955_s1, 4  ;;  %s16_s26 = int_to_ptr.vmem [resolvable:$true] %s15_s26 }
   0x3   :  { %3960 = sst [smem:[#allocation24_spill]] %s3953_s5  ;;  %s2499_s27 = scalar_lea.vmem %s12_s23, 32 }
   0x4   :  { %p2500_p0 = scmp.ne.s32.totalorder %s12_s23, %s2499_s27  ;;  %p2504_p1 = scmp.lt.s32.totalorder %s12_s23, %s12_s23 }
   0x5   :  { %p2505_p2 = scmp.lt.s32.totalorder %s2499_s27, %s2499_s27 }
   0x7   :  { %p2506_p3 = por %p2505_p2, %p2504_p1 }
   0x9   :  { %p2507_p4 = pnand %p2506_p3, %p2500_p0 }
   0xb   :  { %2510 = shalt.err (!%p2507_p4)  }
   0xc   :  { %s2727_s28 = smov [#allocation3]   ;;  %s2511_s29 = scalar_lea.vmem %s16_s26, 32 }
   0xd   :  { %14 = dma.vmem_to_smem %s12_s23, 32, %s2727_s28, [#allocation2] }
   0xe   :  { %p2512_p5 = scmp.ne.s32.totalorder %s16_s26, %s2511_s29  ;;  %p2516_p6 = scmp.lt.s32.totalorder %s16_s26, %s16_s26 }
   0xf   :  { %p2517_p7 = scmp.lt.s32.totalorder %s2511_s29, %s2511_s29 }
  0x11   :  { %p2518_p8 = por %p2517_p7, %p2516_p6 }
  0x13   :  { %p2519_p9 = pnand %p2518_p8, %p2512_p5 }
  0x15   :  { %2522 = shalt.err (!%p2519_p9)  }
  0x16   :  { %s2728_s0 = smov [#allocation4]  }
  0x17   :  { %18 = dma.vmem_to_smem %s16_s26, 32, %s2728_s0, [#allocation2] }
  0x18   :  { %2681 = dma.done.wait [#allocation2], 64 }
  0x19   :  { %2682 = vsyncadd [#allocation2], 4294967232 }
  0x1a   :  { %20 = sfence }
  0x1b   :  { %21 = vsyncpa [#allocation6], 0 }
  0x1c   :  { %23 = vsyncpa [#allocation6 + $0x1], 0 }
  0x1d   :  { %24 = vsyncpa [#allocation9], 0 }
  0x1e   :  { %26 = vsyncpa [#allocation9 + $0x1], 0 }
  0x1f   :  { %27 = vsyncpa [#allocation12], 0 }
  0x20   :  { %28 = vsyncpa [#allocation7], 0 }
  0x21   :  { %30 = vsyncpa [#allocation7 + $0x1], 0  ;;  %s2789_s1 = smov 0   ;;  %s2791_s30 = smov 0  }
  0x22   :  { %s2793_s7 = smov 0   ;;  %s2795_s8 = smov 0  }
  0x23   :  { %s2797_s9 = smov 0   ;;  %s2799_s10 = smov 0  }
  0x24 LB: > { %s2820_s11 = sadd.s32 4294967295, %s2725_s10   ;;  %s2182_s12 = sadd.s32 4294967294, %s2725_s10   ;;  %s2725_s10 = sphi %s2799_s10, %s36_s10   ;;  %s2721_s9 = sphi %s2797_s9, %s3993_s9   ;;  %s2717_s8 = sphi %s2795_s8, %s3992_s8   ;;  %s2713_s7 = sphi %s2793_s7, %s3991_s7   ;;  %s2709_s30 = sphi %s2791_s30, %s3990_s30   ;;  %s2705_s1 = sphi %s2789_s1, %s3989_s1  }
  0x25   : > { %p70_p10 = scmp.ne.s32.totalorder %s2709_s30, %s2705_s1  ;;  %p3956_p11 = scmp.eq.s32.totalorder %s2820_s11, 0 }
  0x26   : > { %p172_p13 = scmp.eq.s32.totalorder %s2182_s12, 1  ;;  %p2183_p1 = scmp.ge.s32.totalorder %s2725_s10, 1 }
  0x27   : > { %p2829_p0 = por %p3956_p11, %p70_p10  ;;  %p179_p3 = scmp.lt.s32.totalorder %s2725_s10, 3 }
  0x28   : > { %p2834_p2 = por %p172_p13, %p70_p10  ;;  %s2729_s16 = smov [#allocation10]  }
  0x29   : > { %p2839_p4 = pnand %p2183_p1, %p179_p3  ;;  %s191_s17 = sshll.u32 %s2729_s16, 4  ;;  %s192_s17 = int_to_ptr.vmem [resolvable:$true] %s191_s17 }
  0x2a   : > { %s3962_s14 = scalar_select %p2834_p2, 1, 0 }
  0x2b   : > { %p2373_p5 = pneg %p2839_p4  ;;  %s2730_s19 = smov [#allocation11]  }
  0x2c   : > { %s204_s20 = sshll.u32 %s2730_s19, 4  ;;  %s2534_s21 = scalar_lea.vmem %s192_s17, 1024  ;;  %s205_s20 = int_to_ptr.vmem [resolvable:$true] %s204_s20 }
  0x2d   : > { %p2848_p7 = pnand %p2373_p5, %p3956_p11  ;;  %p2535_p9 = scmp.ne.s32.totalorder %s192_s17, %s2534_s21 }
  0x2e   : > { %p2542_p1 = scmp.lt.s32.totalorder %s192_s17, %s192_s17  ;;  %p2543_p3 = scmp.lt.s32.totalorder %s2534_s21, %s2534_s21 }
  0x2f   : > { %p2525_p8 = pneg %p2848_p7 }
  0x30   : > { %p2544_p6 = por %p2543_p3, %p2542_p1 }
  0x31   : > { %p2537_p10 = pnand %p2535_p9, %p2525_p8 }
  0x33   : > { %p2538_p13 = pneg %p2537_p10 }
  0x35   : > { %p2545_p5 = pnand %p2544_p6, %p2538_p13 }
  0x37   : > { %2548 = shalt.err (!%p2545_p5)
}
  0x38   : > { %s2731_s22 = smov 64   ;;  %s2732_s23 = smov 4  }
  0x39   : > { %s3965_s4 = sld [smem:[#allocation23_spill]]  ;;  %s2560_s26 = scalar_lea.vmem %s205_s20, 256 }
  0x3a   : > { %p2561_p11 = scmp.ne.s32.totalorder %s205_s20, %s2560_s26  ;;  %p2568_p12 = scmp.lt.s32.totalorder %s205_s20, %s205_s20 }
  0x3b   : > { %p2569_p2 = scmp.lt.s32.totalorder %s2560_s26, %s2560_s26 }
  0x3c   : > { %p2563_p9 = pnand %p2561_p11, %p2525_p8 }
  0x3d   : > { %p2570_p1 = por %p2569_p2, %p2568_p12 }
  0x3e   : > { %p2564_p10 = pneg %p2563_p9 }
  0x3f   : > { %2376 = dma.hbm_to_vmem [thread:$0]  (!%p2848_p7), %s3965_s4, 1024, %s192_s17, [#allocation9], %s2731_s22, %s2731_s22, %s2732_s23  }
  0x40   : > { %p2571_p6 = pnand %p2570_p1, %p2564_p10 }
  0x42   : > { %2574 = shalt.err (!%p2571_p6)
}
  0x43   : > { %s3966_s5 = sld [smem:[#allocation24_spill]]  ;;  %s48_s29 = sadd.s32 1, %s2721_s9 }
  0x44   : > { %s57_s0 = sadd.s32 1, %s2713_s7  ;;  %p50_p11 = scmp.ge.s32.totalorder %s48_s29, 2 }
  0x45   : > { %p64_p12 = scmp.ne.s32.totalorder %s2713_s7, %s2709_s30  ;;  %p65_p2 = scmp.eq.s32.totalorder %s2725_s10, 0 }
  0x46   : > { %p2393_p8 = scmp.lt.s32.totalorder %s2725_s10, 2  ;;  %s3995_s29 = smov (%p50_p11, %s48_s29), 0 }
  0x47   : > { %3967 = sst [smem:[#allocation20_spill]] %s3995_s29  ;;  %p66_p13 = por %p65_p2, %p64_p12 }
  0x48   : > { %p3968_p3 = scmp.eq.s32.totalorder %s2820_s11, 1  ;;  %s52_s16 = ssub.s32 %s2721_s9, %s3995_s29 }
  0x49   : > { %2379 = dma.hbm_to_vmem [thread:$0]  (!%p2848_p7), %s3966_s5, 256, %s205_s20, [#allocation12], %s2731_s22, %s2731_s22, %s2732_s23  }
  0x4a   : > { %p2880_p5 = por %p3968_p3, %p64_p12  ;;  %s218_s17 = sand.u32 1, %s2713_s7  }
  0x4b   : > { %p55_p7 = scmp.eq.s32.totalorder %s52_s16, 0  ;;  %s2887_s18 = sshll.u32 %s218_s17, 5 }
  0x4c   : > { %s2256_s19 = sshll.u32 %s2721_s9, 9  ;;  %s3971_s2 = sld [smem:[#allocation22_spill]] }
  0x4d   : > { %s2891_s20 = scalar_select %p55_p7, %s2713_s7, %s57_s0  }
  0x4e   : > { %s222_s24 = scalar_lea.vmem [#allocation5], %s2887_s18  ;;  %p2901_p9 = pnand %p2393_p8, %p66_p13 }
  0x4f   : > { %3970 = sst [smem:[#allocation21_spill]] %s2891_s20  ;;  %s231_s25 = sshll.u32 %s222_s24, 4  ;;  %s232_s25 = int_to_ptr.vmem [resolvable:$true] %s231_s25 }
  0x50   : > { %s219_s27 = scalar_lea.sflag [#allocation6], %s218_s17  ;;  %p2577_p10 = pneg %p2901_p9 }
  0x51   : > { %s2588_s28 = scalar_lea.vmem %s232_s25, 512  ;;  %s2733_s0 = smov [#allocation5]  }
  0x52   : > { %s230_s23 = scalar_lea.hbm %s3971_s2, %s2256_s19  ;;  %p2589_p1 = scmp.ne.s32.totalorder %s232_s25, %s2588_s28 }
  0x53   : > { %s2593_s16 = sshll.u32 %s2733_s0, 4  ;;  %s2594_s16 = int_to_ptr.vmem [resolvable:$false] %s2593_s16 }
  0x54   : > { %p2591_p6 = pnand %p2589_p1, %p2577_p10  ;;  %s2595_s21 = scalar_lea.vmem %s2594_s16, 1024 }
  0x55   : > { %p2596_p12 = scmp.lt.s32.totalorder %s232_s25, %s2594_s16  ;;  %p2597_p2 = scmp.lt.s32.totalorder %s2595_s21, %s2588_s28 }
  0x56   : > { %p2592_p11 = pneg %p2591_p6 }
  0x57   : > { %p2598_p8 = por %p2597_p2, %p2596_p12 }
  0x59   : > { %p2599_p13 = pnand %p2598_p8, %p2592_p11 }
  0x5b   : > { %2602 = shalt.err (!%p2599_p13)
}
  0x5c   : > { %s2734_s22 = smov 128   ;;  %s2735_s17 = smov 8  }
  0x5d   : > { %2383 = dma.hbm_to_vmem [thread:$0]  (!%p2901_p9), %s230_s23, 512, %s232_s25, %s219_s27, %s2734_s22, %s2734_s22, %s2735_s17  }
  0x5e   : > { %s253_s0 = scalar_lea.hbm %s3951_s3, %s2256_s19  ;;  %s245_s4 = scalar_lea.vmem [#allocation8], %s2887_s18 }
  0x5f   : > { %s254_s16 = sshll.u32 %s245_s4, 4  ;;  %s241_s28 = sand.u32 1, %s2725_s10   ;;  %s255_s16 = int_to_ptr.vmem [resolvable:$true] %s254_s16 }
  0x60   : > { %s242_s21 = scalar_lea.sflag [#allocation9], %s241_s28  ;;  %s2616_s5 = scalar_lea.vmem %s255_s16, 512 }
  0x61   : > { %p2617_p3 = scmp.ne.s32.totalorder %s255_s16, %s2616_s5  ;;  %s2736_s29 = smov [#allocation8]  }
  0x62   : > { %s2621_s20 = sshll.u32 %s2736_s29, 4  ;;  %s2622_s20 = int_to_ptr.vmem [resolvable:$false] %s2621_s20 }
  0x63   : > { %p2619_p7 = pnand %p2617_p3, %p2577_p10  ;;  %s2623_s23 = scalar_lea.vmem %s2622_s20, 1024 }
  0x64   : > { %p2624_p6 = scmp.lt.s32.totalorder %s255_s16, %s2622_s20  ;;  %p2625_p11 = scmp.lt.s32.totalorder %s2623_s23, %s2616_s5 }
  0x65   : > { %p2620_p1 = pneg %p2619_p7 }
  0x66   : > { %p2626_p12 = por %p2625_p11, %p2624_p6 }
  0x68   : > { %p2627_p2 = pnand %p2626_p12, %p2620_p1 }
  0x6a   : > { %2630 = shalt.err (!%p2627_p2)
}
  0x6b   : > { %2386 = dma.hbm_to_vmem [thread:$0]  (!%p2901_p9), %s253_s0, 512, %s255_s16, %s242_s21, %s2734_s22, %s2734_s22, %s2735_s17  }
  0x6c   : > { %266 = sbr.rel (%p2839_p4) target bundleno = 864 (0x360), region = 36  ;;  %s2927_s2 = sand.u32 (!%p2839_p4), 1, %s2709_s30  }
  0x6d   : > { %s2930_s4 = sshll.u32 (!%p2839_p4), %s2927_s2, 5  ;;  %s269_s29 = scalar_lea.sflag (!%p2839_p4), [#allocation6], %s2927_s2 }
  0x6e   : > { %s272_s5 = scalar_lea.vmem (!%p2839_p4), [#allocation5], %s2930_s4 }
  0x71   : > { %2684 = dma.done.wait (%p2829_p0), %s269_s29, 512  }
  0x72   : > { %2686 = vsyncadd (%p2829_p0), %s269_s29, 4294966784  ;;  %s277_s15 = sand.u32 1, %s2820_s11   ;;  %s2940_s19 = scalar_lea.vmem [#allocation8], %s2930_s4 }
  0x73   : > { %s278_s18 = scalar_lea.sflag [#allocation9], %s277_s15 }
  0x74   : > { %2688 = dma.done.wait (%p2829_p0), %s278_s18, 512  }
  0x75   : > { %2690 = vsyncadd (%p2829_p0), %s278_s18, 4294966784  ;;  %p3973_p4 = scmp.eq.s32.totalorder %s2820_s11, 0 }
  0x77   : > { %2692 = dma.done.wait (%p3973_p4), [#allocation9], 1024   ;;  %p3974_p9 = pmov %p3973_p4 }
  0x78   : > { %p3975_p10 = pmov %p3973_p4 }
  0x79   : > { %2694 = vsyncadd (%p3974_p9), [#allocation9], 4294966272 }
  0x7a   : > { %2696 = dma.done.wait (%p3975_p10), [#allocation12], 256   ;;  %p3976_p8 = pmov %p3973_p4 }
  0x7b   : > { %v2954_v0 = vld [vmem:[%s272_s5 + $0x10] sm:$0xff]  ;;  %v2956_v1 = vld [vmem:[%s272_s5] sm:$0xff]  ;;  %v2960_v4 = vld [vmem:[%s272_s5 + $0x18] sm:$0xff]  ;;  %vm563_vm0 = vcmask 261120   ;;  %s2973_s11 = sshll.u32 %s2717_s8, 7 }
  0x7c   : > { %2698 = vsyncadd (%p3976_p8), [#allocation12], 4294967040  ;;  %v329_v2 = vmul.f32 6.25e-05, %v2954_v0  ;;  %v327_v3 = vmul.f32 6.25e-05, %v2956_v1 }
  0x7d   : > { %v330_v7 = vmul.f32 6.25e-05, %v2960_v4  ;;  %v2963_v9 = vld [vmem:[%s272_s5 + $0x8] sm:$0xff]  ;;  %v2465_v10 = vld [vmem:[#allocation10 + $0x38] sm:$0xff]   ;;  %v2466_v13 = vld [vmem:[#allocation10 + $0x30] sm:$0xff]   ;;  %s683_s13 = sld [smem:[#allocation3 + %s2973_s11]] }
  0x7e   : > { %v333_v5 = vfloor.f32 %v329_v2  ;;  %v331_v6 = vfloor.f32 %v327_v3  ;;  %2287 = vmatprep.subr.bf16.mxu0 %v2465_v10  ;;  %v328_v15 = vmul.f32 6.25e-05, %v2963_v9  ;;  %2307 = vmatprep.subr.bf16.mxu1 %v2465_v10  ;;  %v2467_v17 = vld [vmem:[#allocation10 + $0x28] sm:$0xff]   ;;  %v2468_v19 = vld [vmem:[#allocation10 + $0x20] sm:$0xff]   ;;  %v2469_v20 = vld [vmem:[#allocation10 + $0x18] sm:$0xff]   ;;  %vm1983_vm1 = vcmp.gt.f32.partialorder %v2954_v0, 0.0 }
  0x7f   : > { %v334_v12 = vfloor.f32 %v330_v7  ;;  %2288 = vmatpush3.bf16.msra.mxu0 %v2465_v10  ;;  %2308 = vmatpush3.bf16.msra.mxu1 %v2465_v10  ;;  %v2470_v24 = vld [vmem:[#allocation10 + $0x10] sm:$0xff]   ;;  %v2471_v29 = vld [vmem:[#allocation10 + $0x8] sm:$0xff]   ;;  %v2472_v32 = vld [vmem:[#allocation10] sm:$0xff]   ;;  %vm1981_vm2 = vcmp.gt.f32.partialorder %v2956_v1, 0.0  ;;  %vm1984_vm9 = vcmp.gt.f32.partialorder %v2960_v4, 0.0  ;;  %s1559_s26 = sadd.s32 9, %s2973_s11 }
  0x80   : > { %v337_v8 = vsub.f32 %v329_v2, %v333_v5  ;;  %v335_v11 = vsub.f32 %v327_v3, %v331_v6  ;;  %v332_v16 = vfloor.f32 %v328_v15  ;;  %2289 = vmatprep.subr.bf16.mxu0 %v2466_v13  ;;  %2309 = vmatprep.subr.bf16.mxu1 %v2466_v13  ;;  %v2473_v36 = vld [vmem:[#allocation11] sm:$0xff]   ;;  %v2474_v58 = vld [vmem:[#allocation11 + $0x8] sm:$0xff]   ;;  %s3061_s27 = sld [smem:[#allocation4 + %s2973_s11]]  ;;  %vm1982_vm15 = vcmp.gt.f32.partialorder %v2963_v9, 0.0  ;;  %s1601_s28 = sadd.s32 1, %s2973_s11 }
  0x81   : > { %v338_v14 = vsub.f32 %v330_v7, %v334_v12  ;;  %s3064_s22 = sld [smem:[#allocation4 + %s1559_s26]]  ;;  %s1605_s23 = sadd.s32 10, %s2973_s11 }
  0x82   : > { %525 = vadd.xlane.f32.xlu0 %v337_v8  ;;  %521 = vadd.xlane.f32.xlu1 %v335_v11  ;;  %v336_v18 = vsub.f32 %v328_v15, %v332_v16  ;;  %s3267_s21 = sld [smem:[#allocation4 + %s1601_s28]]  ;;  %s1651_s29 = sadd.s32 2, %s2973_s11 }
  0x83   : > { %2290 = vmatpush3.bf16.msra.mxu0 %v2466_v13  ;;  %2310 = vmatpush3.bf16.msra.mxu1 %v2466_v13  ;;  %v340_v27 = vpack.c.bf16 %v338_v14, %v337_v8  ;;  %s684_s20 = scvt.s32.f32 %s683_s13  ;;  %s3322_s15 = sld [smem:[#allocation4 + %s1605_s23]] }
  0x84   : > { %2291 = vmatprep.subr.bf16.mxu0 %v2467_v17  ;;  %2311 = vmatprep.subr.bf16.mxu1 %v2467_v17  ;;  %v339_v21 = vpack.c.bf16 %v336_v18, %v335_v11  ;;  %s3338_s18 = sld [smem:[#allocation4 + %s1651_s29]]  ;;  %s1751_s23 = sadd.s32 4, %s2973_s11 }
  0x85   : > { %v343_v30 = vunpack.c.l.bf16 %v340_v27  ;;  %v344_v31 = vunpack.c.h.bf16 %v340_v27  ;;  %s685_s25 = smul.f32 5.9604645e-08, %s684_s20  ;;  %s1655_s20 = sadd.s32 11, %s2973_s11 }
  0x86   : > { %527 = vadd.xlane.f32.xlu0 %v338_v14  ;;  %523 = vadd.xlane.f32.xlu1 %v336_v18  ;;  %v341_v22 = vunpack.c.l.bf16 %v339_v21  ;;  %v342_v23 = vunpack.c.h.bf16 %v339_v21  ;;  %s1557_s17 = scvt.s32.f32 %s3061_s27  ;;  %s3398_s27 = sld [smem:[#allocation4 + %s1655_s20]] }
  0x87   : > { %2292 = vmatpush3.bf16.msra.mxu0 %v2467_v17  ;;  %2312 = vmatpush3.bf16.msra.mxu1 %v2467_v17  ;;  %v347_v33 = vsub.f32 %v337_v8, %v343_v30  ;;  %v348_v34 = vsub.f32 %v338_v14, %v344_v31  ;;  %s1561_s24 = scvt.s32.f32 %s3064_s22  ;;  %s1755_s29 = sadd.s32 13, %s2973_s11 }
  0x88   : > { %2293 = vmatprep.subr.bf16.mxu0 %v2468_v19  ;;  %2313 = vmatprep.subr.bf16.mxu1 %v2468_v19  ;;  %v345_v25 = vsub.f32 %v335_v11, %v341_v22  ;;  %v346_v26 = vsub.f32 %v336_v18, %v342_v23  ;;  %v2737_v11 = vmov 0   ;;  %v686_v23 = vstv %s685_s25  ;;  %s1558_s0 = smul.f32 9.313226e-10, %s1557_s17  ;;  %s1603_s5 = scvt.s32.f32 %s3267_s21 }
  0x89   : > { %2323 = vmatprep.mubr.bf16.mxu1 %v339_v21  ;;  %v350_v35 = vpack.c.bf16 %v348_v34, %v347_v33  ;;  %2464 = vset.pattern.permute.xlu1 %v2737_v11  ;;  %s1562_s16 = smul.f32 9.313226e-10, %s1561_s24  ;;  %s1607_s25 = scvt.s32.f32 %s3322_s15 }
  0x8a   : > { %v349_v28 = vpack.c.bf16 %v346_v26, %v345_v25  ;;  %2463 = vset.pattern.permute.xlu0 %v2737_v11  ;;  %s1604_s13 = smul.f32 9.313226e-10, %s1603_s5  ;;  %s1653_s26 = scvt.s32.f32 %s3338_s18 }
  0x8b   : > { %2294 = vmatpush3.bf16.msra.mxu0 %v2468_v19  ;;  %2314 = vmatpush3.bf16.msra.mxu1 %v2468_v19  ;;  %s1608_s22 = smul.f32 9.313226e-10, %s1607_s25  ;;  %s1701_s17 = sadd.s32 3, %s2973_s11 }
  0x8c   : > { %2295 = vmatprep.subr.bf16.mxu0 %v2469_v20  ;;  %2315 = vmatprep.subr.bf16.mxu1 %v2469_v20  ;;  %s1654_s24 = smul.f32 9.313226e-10, %s1653_s26  ;;  %s1657_s21 = scvt.s32.f32 %s3398_s27 }
  0x8d   : > { %2303 = vmatprep.mubr.bf16.mxu0 %v349_v28  ;;  %s3480_s15 = sld [smem:[#allocation4 + %s1751_s23]] }
  0x8e   : > { %s1658_s5 = smul.f32 9.313226e-10, %s1657_s21 }
  0x8f   : > { %2296 = vmatpush3.bf16.msra.mxu0 %v2469_v20  ;;  %2316 = vmatpush3.bf16.msra.mxu1 %v2469_v20 }
  0x90   : > { %2297 = vmatprep.subr.bf16.mxu0 %v2470_v24  ;;  %2317 = vmatprep.subr.bf16.mxu1 %v2470_v24 }
  0x93   : > { %2298 = vmatpush3.bf16.msra.mxu0 %v2470_v24  ;;  %2318 = vmatpush3.bf16.msra.mxu1 %v2470_v24  ;;  %s1753_s27 = scvt.s32.f32 %s3480_s15 }
  0x94   : > { %2299 = vmatprep.subr.bf16.mxu0 %v2471_v29  ;;  %2319 = vmatprep.subr.bf16.mxu1 %v2471_v29 }
  0x97   : > { %2300 = vmatpush3.bf16.msra.mxu0 %v2471_v29  ;;  %2320 = vmatpush3.bf16.msra.mxu1 %v2471_v29 }
  0x98   : > { %2301 = vmatprep.subr.bf16.mxu0 %v2472_v32  ;;  %2321 = vmatprep.subr.bf16.mxu1 %v2472_v32 }
  0x9b   : > { %2302 = vmatpush3.bf16.msra.mxu0 %v2472_v32  ;;  %2322 = vmatpush3.bf16.msra.mxu1 %v2472_v32 }
  0x9e   : > { %2304 = vmatmul.mubr.bf16.vlgmr.msra.gmra.mxu0 %v350_v35  ;;  %2324 = vmatmul.mubr.bf16.vlgmr.msra.gmra.mxu1 %v340_v27 }
  0x9f   : > { %2339 = vmatprep.mubr.msk.bf16.mxu1 %vm563_vm0, %v2473_v36  ;;  %2331 = vmatprep.mubr.msk.bf16.mxu0 %vm563_vm0, %v2473_v36 }
 0x10b   : > { %v526_v37 = vpop.xlane.xlu0 %525  ;;  %v522_v38 = vpop.xlane.xlu1 %521 }
 0x10c   : > { %v531_v39 = vfloor.f32 %v526_v37  ;;  %v529_v42 = vfloor.f32 %v522_v38 }
 0x10e   : > { %v535_v43 = vsub.f32 %v526_v37, %v531_v39  ;;  %v533_v48 = vsub.f32 %v522_v38, %v529_v42 }
 0x10f   : > { %v528_v40 = vpop.xlane.xlu0 %527  ;;  %v524_v45 = vpop.xlane.xlu1 %523 }
 0x110   : > { %v532_v41 = vfloor.f32 %v528_v40  ;;  %v530_v46 = vfloor.f32 %v524_v45 }
 0x112   : > { %v536_v44 = vsub.f32 %v528_v40, %v532_v41  ;;  %v534_v49 = vsub.f32 %v524_v45, %v530_v46 }
 0x114   : > { %v538_v47 = vpack.c.bf16 %v536_v44, %v535_v43  ;;  %v537_v52 = vpack.c.bf16 %v534_v49, %v533_v48 }
 0x116   : > { %v542_v50 = vunpack.c.h.bf16 %v538_v47  ;;  %2335 = vmatprep.subr.bf16.mxu1 %v538_v47  ;;  %v541_v51 = vunpack.c.l.bf16 %v538_v47  ;;  %v540_v55 = vunpack.c.h.bf16 %v537_v52  ;;  %v539_v56 = vunpack.c.l.bf16 %v537_v52 }
 0x117   : > { %2336 = vmatpush3.bf16.msra.mxu1 %v538_v47 }
 0x118   : > { %v546_v53 = vsub.f32 %v536_v44, %v542_v50  ;;  %v545_v54 = vsub.f32 %v535_v43, %v541_v51  ;;  %2337 = vmatprep.subr.bf16.mxu1 %v537_v52  ;;  %v544_v59 = vsub.f32 %v534_v49, %v540_v55  ;;  %v543_v60 = vsub.f32 %v533_v48, %v539_v56 }
 0x11a   : > { %v548_v57 = vpack.c.bf16 %v546_v53, %v545_v54  ;;  %v547_v61 = vpack.c.bf16 %v544_v59, %v543_v60 }
 0x11b   : > { %2338 = vmatpush3.bf16.msra.mxu1 %v537_v52 }
 0x11c   : > { %2327 = vmatprep.subr.bf16.mxu0 %v548_v57 }
 0x11d   : > { %2328 = vmatpush3.bf16.msra.mxu0 %v548_v57 }
 0x11e   : > { %2340 = vmatmul.mubr.msk.bf16.vlgmr.msra.gmra.mxu1 %vm563_vm0, %v2474_v58  ;;  %2329 = vmatprep.subr.bf16.mxu0 %v547_v61 }
 0x121   : > { %2330 = vmatpush3.bf16.msra.mxu0 %v547_v61 }
 0x124   : > { %2332 = vmatmul.mubr.msk.bf16.vlgmr.msra.gmra.mxu0 %vm563_vm0, %v2474_v58  ;;  %v2738_v58 = vmov 0.0  }
 0x125   : > { %v2249_v59 = vsel %vm1983_vm1, 1.0, %v2738_v58 }
 0x15e   : > { %v2305_v62 = vpop.f32.mrf.mxu0  ;;  %v2325_v63 = vpop.f32.mrf.mxu1 }
 0x15f   : > { %v507_v2 = vadd.f32 %v2325_v63, %v2305_v62 }
 0x160   : > { %v449_v3 = vpop.f32.mrf.mxu0  ;;  %v498_v5 = vpop.f32.mrf.mxu1 }
 0x161   : > { %v499_v6 = vadd.f32 %v498_v5, %v449_v3  ;;  %v515_v39 = vfloor.f32 %v507_v2  ;;  %v1999_v3 = vsub.f32 1.0, %v2249_v59 }
 0x162   : > { %v2306_v7 = vpop.f32.mrf.mxu0  ;;  %v2326_v8 = vpop.f32.mrf.mxu1 }
 0x163   : > { %v2970_v10 = vadd.f32 %v2326_v8, %v2306_v7  ;;  %v513_v40 = vfloor.f32 %v499_v6  ;;  %v519_v42 = vsub.f32 %v507_v2, %v515_v39  ;;  %v2997_v1 = vmul.f32 0.033333335, %v1999_v3 }
 0x164   : > { %v501_v12 = vpop.f32.mrf.mxu1  ;;  %v452_v14 = vpop.f32.mrf.mxu0 }
 0x165   : > { %v502_v41 = vadd.f32 %v501_v12, %v452_v14  ;;  %v517_v46 = vsub.f32 %v499_v6, %v513_v40  ;;  %v516_v53 = vfloor.f32 %v2970_v10  ;;  %v2991_v12 = vmul.f32 0.003, %v2249_v59 }
 0x166   : > { %v2742_v40 = vmov 2102212464  }
 0x167   : > { %v514_v44 = vfloor.f32 %v502_v41  ;;  %v520_v63 = vsub.f32 %v2970_v10, %v516_v53 }
 0x169   : > { %v518_v52 = vsub.f32 %v502_v41, %v514_v44 }
 0x1de   : > { %v2341_v13 = vpop.f32.mrf.mxu1 }
 0x1e0   : > { %v653_v15 = vpop.f32.mrf.mxu1 }
 0x1e2   : > { %v2342_v18 = vpop.f32.mrf.mxu1 }
 0x1e4   : > { %v2333_v16 = vpop.f32.mrf.mxu0  ;;  %v656_v27 = vpop.f32.mrf.mxu1 }
 0x1e5   : > { %v662_v17 = vadd.f32 %v2341_v13, %v2333_v16 }
 0x1e6   : > { %v604_v19 = vpop.f32.mrf.mxu0 }
 0x1e7   : > { %v670_v20 = vfloor.f32 %v662_v17  ;;  %v654_v21 = vadd.f32 %v653_v15, %v604_v19  ;;  %v2993_v15 = vmul.f32 0.1, %v2249_v59 }
 0x1e8   : > { %v2334_v22 = vpop.f32.mrf.mxu0 }
 0x1e9   : > { %v674_v24 = vsub.f32 %v662_v17, %v670_v20  ;;  %v668_v25 = vfloor.f32 %v654_v21  ;;  %v665_v26 = vadd.f32 %v2342_v18, %v2334_v22  ;;  %v3000_v17 = vsel %vm1981_vm2, 1.0, %v2738_v58 }
 0x1ea   : > { %v607_v28 = vpop.f32.mrf.mxu0 }
 0x1eb   : > { %v672_v29 = vsub.f32 %v654_v21, %v668_v25  ;;  %v657_v30 = vadd.f32 %v656_v27, %v607_v28  ;;  %v689_v31 = vadd.f32 %v686_v23, %v674_v24  ;;  %v671_v32 = vfloor.f32 %v665_v26 }
 0x1ed   : > { %v669_v33 = vfloor.f32 %v657_v30  ;;  %703 = vperm.xlu1 %2464, %v689_v31   ;;  %v687_v34 = vadd.f32 %v686_v23, %v672_v29  ;;  %v675_v36 = vsub.f32 %v665_v26, %v671_v32 }
 0x1ef   : > { %v673_v35 = vsub.f32 %v657_v30, %v669_v33  ;;  %693 = vperm.xlu0 %2463, %v687_v34   ;;  %v690_v38 = vadd.f32 %v686_v23, %v675_v36  ;;  %v2739_v34 = vmov 683565275   ;;  %v2740_v36 = vmov 2475754826  }
 0x1f1   : > { %v688_v37 = vadd.f32 %v686_v23, %v673_v35 }
 0x1f3   : > { %698 = vperm.xlu1 %2464, %v688_v37  }
 0x1f7   : > { %708 = vperm.xlu1 %2464, %v690_v38   ;;  %v2741_v38 = vmov 2131351028  }
 0x268   : > { %v704_v43 = vpop.permute.xlu1 %703 }
 0x269   : > { %v713_v45 = vadd.f32 %v704_v43, %v519_v42  ;;  %v2743_v42 = vmov 920167782  }
 0x26a   : > { %v694_v47 = vpop.permute.xlu0 %693 }
 0x26b   : > { %v717_v48 = vfloor.f32 %v713_v45  ;;  %v711_v49 = vadd.f32 %v694_v47, %v517_v46 }
 0x26d   : > { %v721_v50 = vsub.f32 %v713_v45, %v717_v48  ;;  %v715_v51 = vfloor.f32 %v711_v49 }
 0x26e   : > { %v699_v54 = vpop.permute.xlu1 %698 }
 0x26f   : > { %v2978_v55 = vmul.f32 6.2831855, %v721_v50  ;;  %v719_v56 = vsub.f32 %v711_v49, %v715_v51  ;;  %v712_v57 = vadd.f32 %v699_v54, %v518_v52  ;;  %v2744_v49 = vmov 1326507024  }
 0x271   : > { %v935_v60 = vand.u32 2147483647, %v2978_v55  ;;  %v938_v61 = vand.u32 2139095040, %v2978_v55  ;;  %v2983_v62 = vmul.f32 6.2831855, %v719_v56  ;;  %v716_v0 = vfloor.f32 %v712_v57 }
 0x272   : > { %v709_v2 = vpop.permute.xlu1 %708  ;;  %vm937_vm2 = vcmp.lt.s32.totalorder %v2978_v55, 0 }
 0x273   : > { %v939_v5 = vshrl.u32 %v938_v61, 23  ;;  %v942_v6 = vand.u32 8388607, %v935_v60  ;;  %v727_v7 = vand.u32 2147483647, %v2983_v62  ;;  %v730_v8 = vand.u32 2139095040, %v2983_v62 }
 0x274   : > { %v714_v11 = vadd.f32 %v709_v2, %v520_v63  ;;  %v720_v14 = vsub.f32 %v712_v57, %v716_v0 }
 0x275   : > { %v2222_v13 = vadd.s32 4294967169, %v939_v5  ;;  %v731_v10 = vshrl.u32 %v730_v8, 23  ;;  %v734_v16 = vand.u32 8388607, %v727_v7  ;;  %v943_v20 = vor.u32 8388608, %v942_v6 }
 0x276   : > { %v3002_v19 = vmul.f32 6.2831855, %v720_v14  ;;  %v718_v23 = vfloor.f32 %v714_v11 }
 0x277   : > { %v945_v18 = vadd.s32 1, %v2222_v13  ;;  %v2214_v21 = vadd.s32 4294967169, %v731_v10  ;;  %v735_v22 = vor.u32 8388608, %v734_v16  ;;  %v3005_v29 = vshll.u32 %v943_v20, 8 }
 0x278   : > { %v834_v24 = vand.u32 2139095040, %v3002_v19  ;;  %v722_v32 = vsub.f32 %v714_v11, %v718_v23 }
 0x279   : > { %vm946_vm3 = vcmp.gt.s32.totalorder %v945_v18, 0  ;;  %v737_v26 = vadd.s32 1, %v2214_v21  ;;  %v3007_v30 = vshll.u32 %v735_v22, 8 }
 0x27a   : > { %v947_v25 = vsel %vm946_vm3, %v945_v18, 0  ;;  %v3009_v31 = vshrl.u32 %v834_v24, 23  ;;  %v3030_v10 = vmul.f32 6.2831855, %v722_v32  ;;  %vm3122_vm3 = vcmp.le.f32.partialorder %v935_v60, 0.7853982 }
 0x27b   : > { %v948_v27 = vshrl.u32 %v947_v25, 5  ;;  %v949_v28 = vand.u32 31, %v947_v25  ;;  %vm738_vm4 = vcmp.gt.s32.totalorder %v737_v26, 0 }
 0x27c   : > { %v739_v54 = vsel %vm738_vm4, %v737_v26, 0 }
 0x27d   : > { %v950_v33 = vsub.s32 32, %v949_v28  ;;  %v952_v35 = vshll.u32 %v2739_v34, %v949_v28  ;;  %v955_v37 = vshll.u32 %v2740_v36, %v949_v28  ;;  %v958_v39 = vshll.u32 %v2741_v38, %v949_v28 }
 0x27e   : > { %v961_v41 = vshll.u32 %v2742_v40, %v949_v28  ;;  %v964_v43 = vshll.u32 %v2743_v42, %v949_v28  ;;  %vm967_vm5 = vcmp.lt.s32.totalorder %v948_v27, 1  ;;  %vm968_vm6 = vcmp.lt.s32.totalorder %v948_v27, 2 }
 0x27f   : > { %v953_v44 = vshrl.u32 %v2740_v36, %v950_v33  ;;  %v956_v45 = vshrl.u32 %v2741_v38, %v950_v33  ;;  %v959_v46 = vshrl.u32 %v2742_v40, %v950_v33  ;;  %v951_v47 = vshrl.u32 %v2739_v34, %v950_v33 }
 0x280   : > { %v962_v48 = vshrl.u32 %v2743_v42, %v950_v33  ;;  %v965_v50 = vshrl.u32 %v2744_v49, %v950_v33  ;;  %vm969_vm7 = vcmp.lt.s32.totalorder %v948_v27, 3  ;;  %vm970_vm8 = vcmp.lt.s32.totalorder %v948_v27, 4 }
 0x281   : > { %v954_v51 = vor.u32 %v953_v44, %v952_v35  ;;  %v957_v52 = vor.u32 %v956_v45, %v955_v37  ;;  %v960_v53 = vor.u32 %v959_v46, %v958_v39  ;;  %v741_v59 = vand.u32 31, %v739_v54 }
 0x282   : > { %v963_v56 = vor.u32 %v962_v48, %v961_v41  ;;  %v966_v57 = vor.u32 %v965_v50, %v964_v43  ;;  %v740_v20 = vshrl.u32 %v739_v54, 5 }
 0x283   : > { %v971_v61 = vsel %vm967_vm5, %v951_v47, %v954_v51  ;;  %v972_v0 = vsel %vm970_vm8, %v960_v53, 2102212464  ;;  %v975_v63 = vsel %vm967_vm5, %v954_v51, %v957_v52  ;;  %v979_v2 = vsel %vm967_vm5, %v957_v52, %v960_v53 }
 0x284   : > { %v973_v3 = vsel %vm969_vm7, %v957_v52, %v972_v0  ;;  %v976_v5 = vsel %vm970_vm8, %v963_v56, 920167782  ;;  %v980_v6 = vsel %vm970_vm8, %v966_v57, 1326507024  ;;  %v742_v8 = vsub.s32 32, %v741_v59 }
 0x285   : > { %v974_v11 = vsel %vm968_vm6, %v971_v61, %v973_v3  ;;  %v977_v13 = vsel %vm969_vm7, %v960_v53, %v976_v5  ;;  %v981_v14 = vsel %vm969_vm7, %v963_v56, %v980_v6  ;;  %v744_v21 = vshll.u32 %v2739_v34, %v741_v59 }
 0x286   : > { %v978_v16 = vsel %vm968_vm6, %v975_v63, %v977_v13  ;;  %v982_v18 = vsel %vm968_vm6, %v979_v2, %v981_v14  ;;  %v990_v26 = vmul.u32 %v3005_v29, %v974_v11  ;;  %v745_v28 = vshrl.u32 %v2740_v36, %v742_v8 }
 0x287   : > { %v3036_v22 = vmul.u32.u64.low %v3005_v29, %v982_v18  ;;  %v3037_v23 = vmul.u32.u64.high %v3005_v29, %v982_v18, %v3036_v22  ;;  %v3040_v24 = vmul.u32.u64.low %v3005_v29, %v978_v16  ;;  %v3041_v25 = vmul.u32.u64.high %v3005_v29, %v978_v16, %v3040_v24 }
 0x288   : > { %v747_v27 = vshll.u32 %v2740_v36, %v741_v59  ;;  %v748_v32 = vshrl.u32 %v2741_v38, %v742_v8  ;;  %v750_v33 = vshll.u32 %v2741_v38, %v741_v59  ;;  %v751_v35 = vshrl.u32 %v2742_v40, %v742_v8 }
 0x289   : > { %v753_v37 = vshll.u32 %v2742_v40, %v741_v59  ;;  %v754_v39 = vshrl.u32 %v2743_v42, %v742_v8  ;;  %v746_v41 = vor.u32 %v745_v28, %v744_v21  ;;  %v756_v29 = vshll.u32 %v2743_v42, %v741_v59 }
 0x28a   : > { %v749_v43 = vor.u32 %v748_v32, %v747_v27  ;;  %v757_v44 = vshrl.u32 %v2744_v49, %v742_v8  ;;  %vm992_vm10 = vc.u32 %v3037_v23, %v3040_v24  ;;  %v993_v45 = vadd.s32 1, %v3041_v25 }
 0x28b   : > { %v743_v46 = vshrl.u32 %v2739_v34, %v742_v8  ;;  %v752_v47 = vor.u32 %v751_v35, %v750_v33  ;;  %v755_v48 = vor.u32 %v754_v39, %v753_v37  ;;  %vm759_vm11 = vcmp.lt.s32.totalorder %v740_v20, 1 }
 0x28c   : > { %v758_v50 = vor.u32 %v757_v44, %v756_v29  ;;  %vm760_vm12 = vcmp.lt.s32.totalorder %v740_v20, 2  ;;  %v994_v51 = vsel %vm992_vm10, %v993_v45, %v3041_v25  ;;  %vm761_vm13 = vcmp.lt.s32.totalorder %v740_v20, 3 }
 0x28d   : > { %vm762_vm14 = vcmp.lt.s32.totalorder %v740_v20, 4  ;;  %v767_v52 = vsel %vm759_vm11, %v746_v41, %v749_v43  ;;  %v995_v53 = vadd.s32 %v994_v51, %v990_v26  ;;  %v771_v57 = vsel %vm759_vm11, %v749_v43, %v752_v47 }
 0x28e   : > { %v764_v54 = vsel %vm762_vm14, %v752_v47, 2102212464  ;;  %v768_v56 = vsel %vm762_vm14, %v755_v48, 920167782  ;;  %v763_v59 = vsel %vm759_vm11, %v743_v46, %v746_v41  ;;  %v772_v0 = vsel %vm762_vm14, %v758_v50, 1326507024 }
 0x28f   : > { %v769_v61 = vsel %vm761_vm13, %v752_v47, %v768_v56  ;;  %v2218_v63 = vadd.s32 4294967169, %v3009_v31  ;;  %v996_v2 = vadd.s32 536870912, %v995_v53  ;;  %v765_v3 = vsel %vm761_vm13, %v749_v43, %v764_v54 }
 0x290   : > { %v770_v5 = vsel %vm760_vm12, %v767_v52, %v769_v61  ;;  %v773_v6 = vsel %vm761_vm13, %v755_v48, %v772_v0  ;;  %v1997_v8 = vsub.f32 1.0, %v3000_v17  ;;  %v1993_v16 = vmul.f32 0.003, %v3000_v17 }
 0x291   : > { %v774_v11 = vsel %vm760_vm12, %v771_v57, %v773_v6  ;;  %v3071_v13 = vmul.u32.u64.low %v3007_v30, %v770_v5  ;;  %v3072_v14 = vmul.u32.u64.high %v3007_v30, %v770_v5, %v3071_v13  ;;  %v997_v18 = vshrl.u32 %v996_v2, 30 }
 0x292   : > { %v3076_v31 = vmul.u32.u64.low %v3007_v30, %v774_v11  ;;  %v3077_v21 = vmul.u32.u64.high %v3007_v30, %v774_v11, %v3076_v31  ;;  %v766_v22 = vsel %vm760_vm12, %v763_v59, %v765_v3  ;;  %v831_v25 = vand.u32 2147483647, %v3002_v19 }
 0x293   : > { %v841_v26 = vadd.s32 1, %v2218_v63  ;;  %v3083_v28 = vmul.f32 0.1, %v3000_v17  ;;  %v2250_v27 = vsel %vm1984_vm9, 1.0, %v2738_v58  ;;  %v998_v32 = vshll.u32 %v997_v18, 30 }
 0x294   : > { %v1042_v33 = vand.u32 2139095040, %v3030_v10  ;;  %v2001_v35 = vmul.f32 0.033333335, %v1997_v8  ;;  %v1021_v37 = vsub.s32 4, %v997_v18  ;;  %v785_v9 = vadd.s32 1, %v3072_v14 }
 0x295   : > { %vm842_vm0 = vcmp.gt.s32.totalorder %v841_v26, 0  ;;  %v3092_v20 = vsel %vm1982_vm15, 1.0, %v2738_v58  ;;  %v3095_v39 = vsub.s32 %v995_v53, %v998_v32  ;;  %v782_v17 = vmul.u32 %v3007_v30, %v766_v22 }
 0x296   : > { %vm784_vm1 = vc.u32 %v3077_v21, %v3071_v13  ;;  %v2000_v4 = vsub.f32 1.0, %v2250_v27  ;;  %v838_v43 = vand.u32 8388607, %v831_v25  ;;  %v843_v29 = vsel %vm842_vm0, %v841_v26, 0 }
 0x297   : > { %v786_v41 = vsel %vm784_vm1, %v785_v9, %v3072_v14  ;;  %v1001_v44 = vsub.s32 0, %v3095_v39  ;;  %v1043_v45 = vshrl.u32 %v1042_v33, 23  ;;  %v3106_v46 = vadd.f32 %v2997_v1, %v2991_v12 }
 0x298   : > { %v787_v58 = vadd.s32 %v786_v41, %v782_v17  ;;  %v1998_v30 = vsub.f32 1.0, %v3092_v20  ;;  %v1022_v47 = vsel %vm937_vm2, %v1021_v37, %v997_v18  ;;  %v845_v48 = vand.u32 31, %v843_v29 }
 0x299   : > { %v3111_v50 = vadd.f32 %v2001_v35, %v1993_v16  ;;  %v3113_v51 = vmul.f32 0.003, %v2250_v27  ;;  %v3115_v52 = vmul.f32 0.1, %v2250_v27  ;;  %v2223_v53 = vmin.u32 %v1001_v44, %v3095_v39 }
 0x29a   : > { %v3118_v54 = vmul.f32 0.033333335, %v2000_v4  ;;  %v788_v1 = vadd.s32 536870912, %v787_v58  ;;  %v839_v56 = vor.u32 8388608, %v838_v43  ;;  %v3127_v57 = vmul.f32 0.003, %v3092_v20 }
 0x29b   : > { %v1003_v59 = vclz %v2223_v53  ;;  %v3131_v61 = vsel %vm3122_vm3, 0, %v1022_v47  ;;  %v2226_v0 = vadd.s32 4294967169, %v1043_v45  ;;  %v3133_v63 = vmul.f32 0.033333335, %v1998_v30 }
 0x29c   : > { %v3135_v2 = vstv %s1558_s0  ;;  %v3137_v3 = vshrl.u32 %v788_v1, 30  ;;  %v846_v60 = vsub.s32 32, %v845_v48  ;;  %v3139_v5 = vstv %s1562_s16  ;;  %s1705_s0 = sadd.s32 12, %s2973_s11  ;;  %s3450_s16 = sld [smem:[#allocation4 + %s1701_s17]] }
 0x29d   : > { %v991_v6 = vadd.s32 %v3040_v24, %v3037_v23  ;;  %v2224_v8 = vadd.s32 4294967294, %v1003_v59  ;;  %v1039_v11 = vand.u32 2147483647, %v3030_v10  ;;  %v3145_v14 = vadd.s32 3, %v3131_v61  ;;  %s3454_s28 = sld [smem:[#allocation4 + %s1705_s0]]  ;;  %s1754_s17 = smul.f32 9.313226e-10, %s1753_s27 }
 0x29e   : > { %v3148_v16 = vadd.s32 %v3071_v13, %v3077_v21  ;;  %v790_v18 = vshll.u32 %v3137_v3, 30  ;;  %v3151_v31 = vshll.u32 %v839_v56, 8  ;;  %v3153_v22 = vshrl.u32 %v843_v29, 5 }
 0x29f   : > { %vm2225_vm4 = vcmp.lt.s32.totalorder %v2224_v8, 0  ;;  %v848_v26 = vshll.u32 %v2739_v34, %v845_v48  ;;  %v3156_v27 = vadd.s32 1, %v2226_v0  ;;  %v849_v32 = vshrl.u32 %v2740_v36, %v846_v60 }
 0x2a0   : > { %v1006_v23 = vsel %vm2225_vm4, 0, %v2224_v8  ;;  %v3158_v24 = vsub.s32 %v787_v58, %v790_v18  ;;  %v852_v33 = vshrl.u32 %v2741_v38, %v846_v60  ;;  %v855_v35 = vshrl.u32 %v2742_v40, %v846_v60 }
 0x2a1   : > { %v1007_v13 = vsub.s32 32, %v1006_v23  ;;  %v1011_v21 = vsub.s32 4294967266, %v1006_v23  ;;  %v858_v37 = vshrl.u32 %v2743_v42, %v846_v60  ;;  %v851_v17 = vshll.u32 %v2740_v36, %v845_v48 }
 0x2a2   : > { %v793_v9 = vsub.s32 0, %v3158_v24  ;;  %v854_v4 = vshll.u32 %v2741_v38, %v845_v48  ;;  %v857_v41 = vshll.u32 %v2742_v40, %v845_v48  ;;  %v1008_v43 = vshll.u32 %v3095_v39, %v1006_v23  ;;  %s1703_s18 = scvt.s32.f32 %s3450_s16 }
 0x2a3   : > { %v1009_v29 = vshrl.u32 %v991_v6, %v1007_v13  ;;  %v1012_v44 = vadd.s32 127, %v1011_v21  ;;  %v861_v58 = vshrl.u32 %v2744_v49, %v846_v60  ;;  %v850_v30 = vor.u32 %v849_v32, %v848_v26  ;;  %s1707_s20 = scvt.s32.f32 %s3454_s28  ;;  %s1805_s28 = sadd.s32 14, %s2973_s11 }
 0x2a4   : > { %v2215_v45 = vmin.u32 %v793_v9, %v3158_v24  ;;  %v853_v47 = vor.u32 %v852_v33, %v851_v17  ;;  %v860_v53 = vshll.u32 %v2743_v42, %v845_v48  ;;  %v856_v59 = vor.u32 %v855_v35, %v854_v4  ;;  %s1704_s25 = smul.f32 9.313226e-10, %s1703_s18  ;;  %s3572_s21 = sld [smem:[#allocation4 + %s1805_s28]] }
 0x2a5   : > { %v1010_v1 = vor.u32 %v1009_v29, %v1008_v43  ;;  %v1013_v56 = vshll.u32 %v1012_v44, 23  ;;  %v859_v0 = vor.u32 %v858_v37, %v857_v41  ;;  %vm729_vm5 = vcmp.lt.s32.totalorder %v2983_v62, 0  ;;  %s1708_s26 = smul.f32 9.313226e-10, %s1707_s20  ;;  %s1855_s20 = sadd.s32 15, %s2973_s11 }
 0x2a6   : > { %v795_v8 = vclz %v2215_v45  ;;  %v813_v18 = vsub.s32 4, %v3137_v3  ;;  %v847_v39 = vshrl.u32 %v2739_v34, %v846_v60  ;;  %v862_v6 = vor.u32 %v861_v58, %v860_v53 }
 0x2a7   : > { %v1014_v23 = vor.u32 4788187, %v1013_v56  ;;  %v1017_v13 = vcvt.s32.f32 %v1010_v1  ;;  %vm863_vm6 = vcmp.lt.s32.totalorder %v3153_v22, 1  ;;  %vm864_vm7 = vcmp.lt.s32.totalorder %v3153_v22, 2 }
 0x2a8   : > { %v2216_v26 = vadd.s32 4294967294, %v795_v8  ;;  %vm865_vm8 = vcmp.lt.s32.totalorder %v3153_v22, 3  ;;  %vm866_vm9 = vcmp.lt.s32.totalorder %v3153_v22, 4  ;;  %v871_v48 = vsel %vm863_vm6, %v850_v30, %v853_v47 }
 0x2a9   : > { %v1015_v32 = vand.u32 2147483647, %v1014_v23  ;;  %v867_v33 = vsel %vm863_vm6, %v847_v39, %v850_v30  ;;  %v868_v21 = vsel %vm866_vm9, %v856_v59, 2102212464  ;;  %v872_v35 = vsel %vm866_vm9, %v859_v0, 920167782 }
 0x2aa   : > { %vm2217_vm10 = vcmp.lt.s32.totalorder %v2216_v26, 0  ;;  %v873_v60 = vsel %vm865_vm8, %v856_v59, %v872_v35  ;;  %v875_v37 = vsel %vm863_vm6, %v853_v47, %v856_v59  ;;  %v876_v9 = vsel %vm866_vm9, %v862_v6, 1326507024  ;;  %s1807_s15 = scvt.s32.f32 %s3572_s21 }
 0x2ab   : > { %v1018_v17 = vmul.f32 %v1017_v13, %v1015_v32  ;;  %v798_v4 = vsel %vm2217_vm10, 0, %v2216_v26  ;;  %v869_v41 = vsel %vm865_vm8, %v853_v47, %v868_v21  ;;  %v874_v43 = vsel %vm864_vm7, %v871_v48, %v873_v60 }
 0x2ac   : > { %v799_v29 = vsub.s32 32, %v798_v4  ;;  %v800_v44 = vshll.u32 %v3158_v24, %v798_v4  ;;  %v803_v58 = vsub.s32 4294967266, %v798_v4  ;;  %v877_v45 = vsel %vm865_vm8, %v859_v0, %v876_v9 }
 0x2ad   : > { %v1019_v30 = vxor.u32 2147483648, %v1018_v17  ;;  %v878_v53 = vsel %vm864_vm7, %v875_v37, %v877_v45  ;;  %v3191_v1 = vmul.u32.u64.low %v3151_v31, %v874_v43  ;;  %v3192_v56 = vmul.u32.u64.high %v3151_v31, %v874_v43, %v3191_v1 }
 0x2ae   : > { %v801_v47 = vshrl.u32 %v3148_v16, %v799_v29  ;;  %v804_v59 = vadd.s32 127, %v803_v58  ;;  %v3197_v8 = vmul.u32.u64.low %v3151_v31, %v878_v53  ;;  %v3198_v39 = vmul.u32.u64.high %v3151_v31, %v878_v53, %v3197_v8 }
 0x2af   : > { %v1020_v24 = vsel %vm937_vm2, %v1019_v30, %v1018_v17  ;;  %v814_v0 = vsel %vm729_vm5, %v813_v18, %v3137_v3  ;;  %v870_v6 = vsel %vm864_vm7, %v867_v33, %v869_v41  ;;  %vm1050_vm11 = vcmp.gt.s32.totalorder %v3156_v27, 0 }
 0x2b0   : > { %v1023_v16 = vsel %vm3122_vm3, %v2978_v55, %v1020_v24  ;;  %v802_v23 = vor.u32 %v801_v47, %v800_v44  ;;  %v805_v13 = vshll.u32 %v804_v59, 23  ;;  %v1051_v26 = vsel %vm1050_vm11, %v3156_v27, 0 }
 0x2b1   : > { %2475 = vcosq.f32 %v1023_v16  ;;  %vm3214_vm12 = vcmp.le.f32.partialorder %v727_v7, 0.7853982  ;;  %v889_v3 = vadd.s32 1, %v3192_v56  ;;  %v1053_v22 = vand.u32 31, %v1051_v26 }
 0x2b2   : > { %2477 = vsinq.f32 %v1023_v16  ;;  %v3220_v18 = vand.u32 3, %v3131_v61  ;;  %v806_v12 = vor.u32 4788187, %v805_v13  ;;  %v816_v32 = vsel %vm3214_vm12, 0, %v814_v0 }
 0x2b3   : > { %v886_v27 = vmul.u32 %v3151_v31, %v870_v6  ;;  %vm888_vm13 = vc.u32 %v3198_v39, %v3191_v1  ;;  %v3229_v7 = vand.u32 8388607, %v1039_v11  ;;  %v1054_v33 = vsub.s32 32, %v1053_v22 }
 0x2b4   : > { %v3232_v21 = vand.u32 3, %v3145_v14  ;;  %v807_v35 = vand.u32 2147483647, %v806_v12  ;;  %v809_v61 = vcvt.s32.f32 %v802_v23  ;;  %v890_v60 = vsel %vm888_vm13, %v889_v3, %v3192_v56 }
 0x2b5   : > { %v820_v37 = vadd.s32 3, %v816_v32  ;;  %v3235_v9 = vand.u32 3, %v816_v32  ;;  %v891_v17 = vadd.s32 %v890_v60, %v886_v27  ;;  %v1062_v31 = vshll.u32 %v2741_v38, %v1053_v22 }
 0x2b6   : > { %v810_v4 = vmul.f32 %v809_v61, %v807_v35  ;;  %v1057_v41 = vshrl.u32 %v2740_v36, %v1054_v33  ;;  %v1063_v43 = vshrl.u32 %v2742_v40, %v1054_v33  ;;  %v1066_v29 = vshrl.u32 %v2743_v42, %v1054_v33 }
 0x2b7   : > { %v892_v14 = vadd.s32 536870912, %v891_v17  ;;  %v3241_v44 = vshrl.u32 %v1051_v26, 5  ;;  %v1056_v58 = vshll.u32 %v2739_v34, %v1053_v22  ;;  %v1060_v45 = vshrl.u32 %v2741_v38, %v1054_v33 }
 0x2b8   : > { %vm1034_vm14 = vcmp.eq.s32.totalorder %v3232_v21, 2  ;;  %vm1447_vm15 = vcmp.eq.s32.totalorder %v3220_v18, 2  ;;  %v811_v30 = vxor.u32 2147483648, %v810_v4  ;;  %v1064_v53 = vor.u32 %v1063_v43, %v1062_v31 }
 0x2b9   : > { %v1065_v56 = vshll.u32 %v2742_v40, %v1053_v22  ;;  %v1069_v47 = vshrl.u32 %v2744_v49, %v1054_v33  ;;  %vm1031_vm0 = vcmp.eq.s32.totalorder %v3232_v21, 0  ;;  %vm1444_vm1 = vcmp.eq.s32.totalorder %v3220_v18, 0 }
 0x2ba   : > { %v3252_v59 = vand.u32 3, %v820_v37  ;;  %vm833_vm2 = vcmp.lt.s32.totalorder %v3002_v19, 0  ;;  %v893_v38 = vshrl.u32 %v892_v14, 30  ;;  %v1047_v8 = vor.u32 8388608, %v3229_v7 }
 0x2bb   : > { %v1059_v24 = vshll.u32 %v2740_v36, %v1053_v22  ;;  %vm1030_vm3 = vcmp.lt.s32.totalorder %v3232_v21, 2  ;;  %vm1443_vm4 = vcmp.lt.s32.totalorder %v3220_v18, 2  ;;  %v812_v40 = vsel %vm729_vm5, %v811_v30, %v810_v4 }
 0x2bc   : > { %v1058_v49 = vor.u32 %v1057_v41, %v1056_v58  ;;  %v1067_v0 = vor.u32 %v1066_v29, %v1065_v56  ;;  %v1068_v6 = vshll.u32 %v2743_v42, %v1053_v22  ;;  %vm1027_vm6 = vweird.f32 %v2978_v55 }
 0x2bd   : > { %v815_v16 = vsel %vm3214_vm12, %v2983_v62, %v812_v40  ;;  %v894_v23 = vshll.u32 %v893_v38, 30  ;;  %v1061_v13 = vor.u32 %v1060_v45, %v1059_v24  ;;  %vm1074_vm7 = vcmp.lt.s32.totalorder %v3241_v44, 4 }
 0x2be   : > { %2479 = vcosq.f32 %v815_v16  ;;  %v3271_v36 = vadd.s32 %v3191_v1, %v3198_v39  ;;  %v1070_v26 = vor.u32 %v1069_v47, %v1068_v6  ;;  %v1076_v42 = vsel %vm1074_vm7, %v1064_v53, 2102212464  ;;  %v2476_v1 = vpop.eup %2475 }
 0x2bf   : > { %2481 = vsinq.f32 %v815_v16  ;;  %vm3277_vm5 = vcmp.le.f32.partialorder %v831_v25, 0.7853982  ;;  %v3281_v3 = vsub.s32 %v891_v17, %v894_v23  ;;  %v1055_v22 = vshrl.u32 %v2739_v34, %v1054_v33  ;;  %v2478_v12 = vpop.eup %2477 }
 0x2c0   : > { %vm1071_vm8 = vcmp.lt.s32.totalorder %v3241_v44, 1  ;;  %v917_v39 = vsub.s32 4, %v893_v38  ;;  %vm1072_vm9 = vcmp.lt.s32.totalorder %v3241_v44, 2  ;;  %vm1073_vm10 = vcmp.lt.s32.totalorder %v3241_v44, 3 }
 0x2c1   : > { %v1080_v25 = vsel %vm1074_vm7, %v1067_v0, 920167782  ;;  %v1035_v32 = vxor.u32 2147483648, %v2476_v1  ;;  %v897_v27 = vsub.s32 0, %v3281_v3  ;;  %v1075_v7 = vsel %vm1071_vm8, %v1055_v22, %v1058_v49 }
 0x2c2   : > { %v1077_v34 = vsel %vm1073_vm10, %v1061_v13, %v1076_v42  ;;  %v1032_v33 = vxor.u32 2147483648, %v2478_v12  ;;  %v1079_v35 = vsel %vm1071_vm8, %v1058_v49, %v1061_v13  ;;  %v1083_v61 = vsel %vm1071_vm8, %v1061_v13, %v1064_v53 }
 0x2c3   : > { %v1084_v60 = vsel %vm1074_vm7, %v1070_v26, 1326507024  ;;  %v1036_v37 = vsel %vm1034_vm14, %v1035_v32, %v2478_v12  ;;  %v1449_v17 = vsel %vm1447_vm15, %v1035_v32, %v2478_v12  ;;  %v2219_v31 = vmin.u32 %v897_v27, %v3281_v3 }
 0x2c4   : > { %v1081_v4 = vsel %vm1073_vm10, %v1064_v53, %v1080_v25  ;;  %v1033_v41 = vsel %vm1031_vm0, %v2476_v1, %v1032_v33  ;;  %v1446_v43 = vsel %vm1444_vm1, %v2476_v1, %v1032_v33  ;;  %v918_v29 = vsel %vm833_vm2, %v917_v39, %v893_v38 }
 0x2c5   : > { %v3311_v14 = vsel %vm1072_vm9, %v1075_v7, %v1077_v34  ;;  %v1037_v58 = vsel %vm1030_vm3, %v1033_v41, %v1036_v37  ;;  %v1450_v45 = vsel %vm1443_vm4, %v1446_v43, %v1449_v17  ;;  %vm826_vm11 = vcmp.eq.s32.totalorder %v3252_v59, 2 }
 0x2c6   : > { %vm1241_vm12 = vcmp.eq.s32.totalorder %v3235_v9, 2  ;;  %v899_v30 = vclz %v2219_v31  ;;  %v1085_v53 = vsel %vm1073_vm10, %v1067_v0, %v1084_v60  ;;  %v3326_v56 = vsel %vm1027_vm6, nan, %v1037_v58 }
 0x2c7   : > { %v3330_v21 = vsel %vm1027_vm6, nan, %v1450_v45  ;;  %vm823_vm13 = vcmp.eq.s32.totalorder %v3252_v59, 0  ;;  %vm1238_vm14 = vcmp.eq.s32.totalorder %v3235_v9, 0  ;;  %v1082_v18 = vsel %vm1072_vm9, %v1079_v35, %v1081_v4 }
 0x2c8   : > { %v3336_v47 = vshll.u32 %v1047_v8, 8  ;;  %v1566_v38 = vmul.f32 %v3135_v2, %v3326_v56  ;;  %v1575_v24 = vmul.f32 %v3139_v5, %v3330_v21  ;;  %v1583_v55 = vmul.f32 %v3330_v21, %v3326_v56 }
 0x2c9   : > { %v1591_v40 = vmul.f32 %v3330_v21, %v3330_v21  ;;  %v1595_v49 = vmul.f32 %v3326_v56, %v3326_v56  ;;  %vm822_vm15 = vcmp.lt.s32.totalorder %v3252_v59, 2  ;;  %vm1237_vm0 = vcmp.lt.s32.totalorder %v3235_v9, 2 }
 0x2ca   : > { %v2220_v8 = vadd.s32 4294967294, %v899_v30  ;;  %v3354_v0 = vsel %vm3277_vm5, 0, %v918_v29  ;;  %v1086_v6 = vsel %vm1072_vm9, %v1083_v61, %v1085_v53  ;;  %v3358_v16 = vadd.f32 %v1575_v24, %v1566_v38 }
 0x2cb   : > { %v3360_v23 = vadd.f32 %v1583_v55, %v1583_v55  ;;  %vm819_vm1 = vweird.f32 %v2983_v62  ;;  %v3364_v13 = vmul.u32.u64.low %v3336_v47, %v1086_v6  ;;  %v3365_v26 = vmul.u32.u64.high %v3336_v47, %v1086_v6, %v3364_v13  ;;  %v2480_v44 = vpop.eup %2479 }
 0x2cc   : > { %v3367_v42 = vsub.f32 %v1591_v40, %v1595_v49  ;;  %vm2221_vm3 = vcmp.lt.s32.totalorder %v2220_v8, 0  ;;  %v3370_v22 = vmul.u32.u64.low %v3336_v47, %v1082_v18  ;;  %v3371_v1 = vmul.u32.u64.high %v3336_v47, %v1082_v18, %v3370_v22  ;;  %v2482_v27 = vpop.eup %2481 }
 0x2cd   : > { %v1629_v39 = vmul.f32 %v3360_v23, %v3330_v21  ;;  %v1645_v25 = vmul.f32 %v3360_v23, %v3326_v56  ;;  %v902_v12 = vsel %vm2221_vm3, 0, %v2220_v8  ;;  %v1094_v32 = vmul.u32 %v3336_v47, %v3311_v14 }
 0x2ce   : > { %v1633_v7 = vmul.f32 %v3367_v42, %v3326_v56  ;;  %v1641_v34 = vmul.f32 %v3367_v42, %v3330_v21  ;;  %v827_v33 = vxor.u32 2147483648, %v2480_v44  ;;  %v903_v35 = vsub.s32 32, %v902_v12 }
 0x2cf   : > { %v824_v61 = vxor.u32 2147483648, %v2482_v27  ;;  %v904_v60 = vshll.u32 %v3281_v3, %v902_v12  ;;  %v907_v37 = vsub.s32 4294967266, %v902_v12  ;;  %v3387_v17 = vstv %s1604_s13  ;;  %s3486_s13 = sld [smem:[#allocation4 + %s1755_s29]]  ;;  %s1851_s29 = sadd.s32 6, %s2973_s11 }
 0x2d0   : > { %v3389_v31 = vadd.f32 %v1633_v7, %v1629_v39  ;;  %v3391_v4 = vsub.f32 %v1641_v34, %v1645_v25  ;;  %v828_v41 = vsel %vm826_vm11, %v827_v33, %v2482_v27  ;;  %v1243_v43 = vsel %vm1241_vm12, %v827_v33, %v2482_v27  ;;  %s3625_s18 = sld [smem:[#allocation4 + %s1851_s29]] }
 0x2d1   : > { %v825_v3 = vsel %vm823_vm13, %v2480_v44, %v824_v61  ;;  %v1240_v29 = vsel %vm1238_vm14, %v2480_v44, %v824_v61  ;;  %v905_v14 = vshrl.u32 %v3271_v36, %v903_v35  ;;  %v908_v58 = vadd.s32 127, %v907_v37 }
 0x2d2   : > { %v3407_v45 = vmul.f32 %v3389_v31, %v3330_v21  ;;  %v3411_v30 = vmul.f32 %v3391_v4, %v3326_v56  ;;  %v3415_v53 = vmul.f32 %v3391_v4, %v3330_v21  ;;  %v3419_v18 = vmul.f32 %v3389_v31, %v3326_v56 }
 0x2d3   : > { %v829_v36 = vsel %vm822_vm15, %v825_v3, %v828_v41  ;;  %v1244_v47 = vsel %vm1237_vm0, %v1240_v29, %v1243_v43  ;;  %v906_v38 = vor.u32 %v905_v14, %v904_v60  ;;  %v909_v24 = vshll.u32 %v908_v58, 23 }
 0x2d4   : > { %v3428_v55 = vsel %vm819_vm1, nan, %v829_v36  ;;  %v3432_v40 = vsel %vm819_vm1, nan, %v1244_v47  ;;  %vm1096_vm4 = vc.u32 %v3365_v26, %v3370_v22  ;;  %v1097_v59 = vadd.s32 1, %v3371_v1 }
 0x2d5   : > { %v1564_v9 = vmul.f32 %v3135_v2, %v3428_v55  ;;  %v1573_v49 = vmul.f32 %v3139_v5, %v3432_v40  ;;  %v1581_v8 = vmul.f32 %v3432_v40, %v3428_v55  ;;  %v1589_v62 = vmul.f32 %v3432_v40, %v3432_v40 }
 0x2d6   : > { %v1593_v6 = vmul.f32 %v3428_v55, %v3428_v55  ;;  %v910_v13 = vor.u32 4788187, %v909_v24  ;;  %v913_v44 = vcvt.s32.f32 %v906_v38  ;;  %vm1041_vm6 = vcmp.lt.s32.totalorder %v3030_v10, 0 }
 0x2d7   : > { %v1098_v39 = vsel %vm1096_vm4, %v1097_v59, %v3371_v1  ;;  %v1577_v25 = vadd.f32 %v1573_v49, %v1564_v9  ;;  %v1585_v12 = vadd.f32 %v1581_v8, %v1581_v8  ;;  %v1612_v7 = vmul.f32 %v3387_v17, %v3360_v23 }
 0x2d8   : > { %v1099_v27 = vadd.s32 %v1098_v39, %v1094_v32  ;;  %v1597_v34 = vsub.f32 %v1589_v62, %v1593_v6  ;;  %v911_v33 = vand.u32 2147483647, %v910_v13  ;;  %v3456_v35 = vstv %s1608_s22  ;;  %s1757_s22 = scvt.s32.f32 %s3486_s13  ;;  %s1808_s13 = smul.f32 9.313226e-10, %s1807_s15 }
 0x2d9   : > { %v3459_v61 = vstv %s1654_s24  ;;  %v1627_v1 = vmul.f32 %v1585_v12, %v3432_v40  ;;  %v1643_v60 = vmul.f32 %v1585_v12, %v3428_v55  ;;  %v1610_v32 = vmul.f32 %v3387_v17, %v1585_v12  ;;  %s1801_s24 = sadd.s32 5, %s2973_s11 }
 0x2da   : > { %v1100_v37 = vadd.s32 536870912, %v1099_v27  ;;  %v1631_v41 = vmul.f32 %v1597_v34, %v3428_v55  ;;  %v1639_v23 = vmul.f32 %v1597_v34, %v3432_v40  ;;  %v914_v43 = vmul.f32 %v913_v44, %v911_v33  ;;  %s1758_s0 = smul.f32 9.313226e-10, %s1757_s22  ;;  %s3559_s16 = sld [smem:[#allocation4 + %s1801_s24]] }
 0x2db   : > { %v1616_v3 = vadd.f32 %v1612_v7, %v3358_v16  ;;  %v1614_v14 = vadd.f32 %v1610_v32, %v1577_v25  ;;  %v1619_v58 = vmul.f32 %v3456_v35, %v1597_v34  ;;  %v1621_v36 = vmul.f32 %v3456_v35, %v3367_v42 }
 0x2dc   : > { %v1101_v29 = vshrl.u32 %v1100_v37, 30  ;;  %v1635_v47 = vadd.f32 %v1631_v41, %v1627_v1  ;;  %v1647_v38 = vsub.f32 %v1639_v23, %v1643_v60  ;;  %v915_v24 = vxor.u32 2147483648, %v914_v43 }
 0x2dd   : > { %v1662_v59 = vmul.f32 %v3459_v61, %v3389_v31  ;;  %vm3476_vm7 = vcmp.le.f32.partialorder %v1039_v11, 0.7853982  ;;  %v1625_v8 = vadd.f32 %v1621_v36, %v1616_v3  ;;  %v924_v6 = vadd.s32 3, %v3354_v0 }
 0x2de   : > { %v1102_v9 = vshll.u32 %v1101_v29, 30  ;;  %v1125_v49 = vsub.s32 4, %v1101_v29  ;;  %v1677_v42 = vmul.f32 %v1635_v47, %v3432_v40  ;;  %v1681_v62 = vmul.f32 %v1647_v38, %v3428_v55 }
 0x2df   : > { %v1623_v13 = vadd.f32 %v1619_v58, %v1614_v14  ;;  %v916_v11 = vsel %vm833_vm2, %v915_v24, %v914_v43  ;;  %v1660_v39 = vmul.f32 %v3459_v61, %v1635_v47  ;;  %v1666_v7 = vadd.f32 %v1662_v59, %v1625_v8 }
 0x2e0   : > { %v3490_v31 = vsub.s32 %v1099_v27, %v1102_v9  ;;  %v1126_v44 = vsel %vm1041_vm6, %v1125_v49, %v1101_v29  ;;  %v919_v25 = vsel %vm3277_vm5, %v3002_v19, %v916_v11  ;;  %v3501_v34 = vstv %s1658_s5  ;;  %s1803_s23 = scvt.s32.f32 %s3559_s16  ;;  %s1905_s16 = sadd.s32 16, %s2973_s11 }
 0x2e1   : > { %v1128_v12 = vsel %vm3476_vm7, 0, %v1126_v44  ;;  %v1689_v33 = vmul.f32 %v1647_v38, %v3432_v40  ;;  %2483 = vcosq.f32 %v919_v25  ;;  %v1693_v60 = vmul.f32 %v1635_v47, %v3428_v55  ;;  %s3758_s28 = sld [smem:[#allocation4 + %s1905_s16]] }
 0x2e2   : > { %v1105_v27 = vsub.s32 0, %v3490_v31  ;;  %v1132_v1 = vadd.s32 3, %v1128_v12  ;;  %2485 = vsinq.f32 %v919_v25  ;;  %v1664_v37 = vadd.f32 %v1660_v39, %v1623_v13  ;;  %s1804_s5 = smul.f32 9.313226e-10, %s1803_s23 }
 0x2e3   : > { %v1671_v48 = vmul.f32 %v3501_v34, %v3391_v4  ;;  %v3510_v32 = vadd.f32 %v3133_v63, %v3127_v57  ;;  %v3513_v41 = vand.u32 3, %v3354_v0  ;;  %v1669_v43 = vmul.f32 %v3501_v34, %v1647_v38 }
 0x2e4   : > { %v2227_v23 = vmin.u32 %v1105_v27, %v3490_v31  ;;  %v3517_v3 = vand.u32 3, %v924_v6  ;;  %v1095_v29 = vadd.s32 %v3370_v22, %v3365_v26  ;;  %v1685_v14 = vadd.f32 %v1681_v62, %v1677_v42 }
 0x2e5   : > { %v1675_v4 = vadd.f32 %v1671_v48, %v1666_v7  ;;  %v3521_v36 = vand.u32 3, %v1132_v1  ;;  %v3523_v57 = vand.u32 3, %v1128_v12  ;;  %v1673_v63 = vadd.f32 %v1669_v43, %v1664_v37 }
 0x2e6   : > { %v1107_v58 = vclz %v2227_v23  ;;  %v1687_v0 = vadd.f32 %v3411_v30, %v3407_v45  ;;  %v1697_v47 = vsub.f32 %v1689_v33, %v1693_v60  ;;  %v1699_v38 = vsub.f32 %v3415_v53, %v3419_v18 }
 0x2e7   : > { %v3530_v24 = vstv %s1704_s25  ;;  %v3534_v59 = vstv %s1708_s26  ;;  %v1727_v9 = vmul.f32 %v1685_v14, %v3432_v40  ;;  %vm930_vm2 = vcmp.eq.s32.totalorder %v3517_v3, 2  ;;  %s1853_s25 = scvt.s32.f32 %s3625_s18  ;;  %s3661_s26 = sld [smem:[#allocation4 + %s1855_s20]] }
 0x2e8   : > { %v2228_v26 = vadd.s32 4294967294, %v1107_v58  ;;  %v1710_v22 = vmul.f32 %v3530_v24, %v1685_v14  ;;  %vm1344_vm5 = vcmp.eq.s32.totalorder %v3513_v41, 2  ;;  %v1712_v45 = vmul.f32 %v3530_v24, %v1687_v0  ;;  %s1907_s29 = scvt.s32.f32 %s3758_s28  ;;  %s1955_s18 = sadd.s32 17, %s2973_s11 }
 0x2e9   : > { %v1719_v30 = vmul.f32 %v3534_v59, %v1697_v47  ;;  %v1721_v53 = vmul.f32 %v3534_v59, %v1699_v38  ;;  %v1729_v18 = vmul.f32 %v1687_v0, %v3330_v21  ;;  %vm927_vm8 = vcmp.eq.s32.totalorder %v3517_v3, 0  ;;  %s1854_s27 = smul.f32 9.313226e-10, %s1853_s25  ;;  %s2745_s28 = smov [#allocation13]  }
 0x2ea   : > { %vm1341_vm9 = vcmp.eq.s32.totalorder %v3513_v41, 0  ;;  %vm2229_vm10 = vcmp.lt.s32.totalorder %v2228_v26, 0  ;;  %v1714_v49 = vadd.f32 %v1710_v22, %v1673_v63  ;;  %v1731_v8 = vmul.f32 %v1697_v47, %v3428_v55  ;;  %s1908_s15 = smul.f32 9.313226e-10, %s1907_s29 }
 0x2eb   : > { %v1733_v42 = vmul.f32 %v1699_v38, %v3326_v56  ;;  %vm926_vm11 = vcmp.lt.s32.totalorder %v3517_v3, 2  ;;  %vm1340_vm12 = vcmp.lt.s32.totalorder %v3513_v41, 2  ;;  %v1110_v62 = vsel %vm2229_vm10, 0, %v2228_v26 }
 0x2ec   : > { %v1716_v6 = vadd.f32 %v1712_v45, %v1675_v4  ;;  %v1739_v13 = vmul.f32 %v1697_v47, %v3432_v40  ;;  %v1741_v11 = vmul.f32 %v1699_v38, %v3330_v21  ;;  %vm923_vm13 = vweird.f32 %v3002_v19 }
 0x2ed   : > { %v1111_v44 = vsub.s32 32, %v1110_v62  ;;  %v1112_v39 = vshll.u32 %v3490_v31, %v1110_v62  ;;  %v1115_v25 = vsub.s32 4294967266, %v1110_v62  ;;  %v1723_v12 = vadd.f32 %v1719_v30, %v1714_v49  ;;  %s1857_s22 = scvt.s32.f32 %s3661_s26 }
 0x2ee   : > { %v1725_v7 = vadd.f32 %v1721_v53, %v1716_v6  ;;  %v3554_v33 = vadd.f32 %v1731_v8, %v1727_v9  ;;  %v3556_v27 = vadd.f32 %v1733_v42, %v1729_v18  ;;  %v1743_v1 = vmul.f32 %v1685_v14, %v3428_v55  ;;  %v2484_v43 = vpop.eup %2483 }
 0x2ef   : > { %v1113_v60 = vshrl.u32 %v1095_v29, %v1111_v44  ;;  %v1116_v37 = vadd.s32 127, %v1115_v25  ;;  %v1745_v48 = vmul.f32 %v1687_v0, %v3326_v56  ;;  %v3562_v23 = vstv %s1754_s17  ;;  %v2486_v14 = vpop.eup %2485  ;;  %s1901_s17 = sadd.s32 7, %s2973_s11  ;;  %s1858_s24 = smul.f32 9.313226e-10, %s1857_s22 }
 0x2f0   : > { %v1747_v31 = vsub.f32 %v1739_v13, %v1743_v1  ;;  %v1760_v4 = vmul.f32 %v3562_v23, %v3554_v33  ;;  %v1762_v58 = vmul.f32 %v3562_v23, %v3556_v27  ;;  %v3569_v63 = vstv %s1758_s0  ;;  %s3736_s0 = sld [smem:[#allocation4 + %s1901_s17]]  ;;  %s318_s22 = scalar_lea.vmem [#allocation13], %s2930_s4 }
 0x2f1   : > { %v931_v47 = vxor.u32 2147483648, %v2484_v43  ;;  %v1114_v38 = vor.u32 %v1113_v60, %v1112_v39  ;;  %v1117_v29 = vshll.u32 %v1116_v37, 23  ;;  %v1749_v26 = vsub.f32 %v1741_v11, %v1745_v48  ;;  %s2049_s17 = sshll.u32 %s318_s22, 4  ;;  %s3901_s17 = int_to_ptr.vmem [resolvable:$true] %s2049_s17 }
 0x2f2   : > { %v928_v22 = vxor.u32 2147483648, %v2486_v14  ;;  %v1764_v0 = vadd.f32 %v1760_v4, %v1723_v12  ;;  %v1766_v9 = vadd.f32 %v1762_v58, %v1725_v7  ;;  %v1769_v45 = vmul.f32 %v3569_v63, %v1747_v31  ;;  %s2631_s4 = scalar_lea.vmem %s3901_s17, 512 }
 0x2f3   : > { %v932_v30 = vsel %vm930_vm2, %v931_v47, %v2486_v14  ;;  %v1346_v53 = vsel %vm1344_vm5, %v931_v47, %v2486_v14  ;;  %v1118_v18 = vor.u32 4788187, %v1117_v29  ;;  %v1121_v49 = vcvt.s32.f32 %v1114_v38  ;;  %p2632_p0 = scmp.ne.s32.totalorder %s3901_s17, %s2631_s4 }
 0x2f4   : > { %v929_v8 = vsel %vm927_vm8, %v2484_v43, %v928_v22  ;;  %v1343_v42 = vsel %vm1341_vm9, %v2484_v43, %v928_v22  ;;  %v1771_v62 = vmul.f32 %v3569_v63, %v1749_v26  ;;  %v1773_v6 = vadd.f32 %v1769_v45, %v1764_v0 }
 0x2f5   : > { %v933_v13 = vsel %vm926_vm11, %v929_v8, %v932_v30  ;;  %v1347_v11 = vsel %vm1340_vm12, %v1343_v42, %v1346_v53  ;;  %v1119_v44 = vand.u32 2147483647, %v1118_v18  ;;  %v1777_v39 = vmul.f32 %v3554_v33, %v3432_v40  ;;  %p2633_p13 = pnand %p2632_p0, %p2880_p5 }
 0x2f6   : > { %v3591_v25 = vsel %vm923_vm13, nan, %v933_v13  ;;  %v3595_v12 = vsel %vm923_vm13, nan, %v1347_v11  ;;  %v1775_v7 = vadd.f32 %v1771_v62, %v1766_v9  ;;  %v1779_v3 = vmul.f32 %v3556_v27, %v3330_v21  ;;  %s1903_s21 = scvt.s32.f32 %s3736_s0 }
 0x2f7   : > { %v1565_v41 = vmul.f32 %v3135_v2, %v3591_v25  ;;  %v1574_v1 = vmul.f32 %v3139_v5, %v3595_v12  ;;  %v1582_v60 = vmul.f32 %v3595_v12, %v3591_v25  ;;  %v1590_v19 = vmul.f32 %v3595_v12, %v3595_v12  ;;  %p2634_p3 = pneg %p2633_p13 }
 0x2f8   : > { %v1594_v37 = vmul.f32 %v3591_v25, %v3591_v25  ;;  %v1122_v48 = vmul.f32 %v1121_v49, %v1119_v44  ;;  %v1781_v43 = vmul.f32 %v1747_v31, %v3428_v55  ;;  %v1783_v4 = vmul.f32 %v1749_v26, %v3326_v56  ;;  %s1904_s23 = smul.f32 9.313226e-10, %s1903_s21  ;;  %s2635_s21 = sshll.u32 %s2745_s28, 4  ;;  %s2636_s21 = int_to_ptr.vmem [resolvable:$false] %s2635_s21 }
 0x2f9   : > { %v1578_v58 = vadd.f32 %v1574_v1, %v1565_v41  ;;  %v1586_v14 = vadd.f32 %v1582_v60, %v1582_v60  ;;  %v1789_v47 = vmul.f32 %v1747_v31, %v3432_v40  ;;  %v1791_v38 = vmul.f32 %v1749_v26, %v3330_v21  ;;  %p2638_p7 = scmp.lt.s32.totalorder %s3901_s17, %s2636_s21 }
 0x2fa   : > { %v1598_v29 = vsub.f32 %v1590_v19, %v1594_v37  ;;  %v1123_v22 = vxor.u32 2147483648, %v1122_v48  ;;  %v3615_v0 = vadd.f32 %v1781_v43, %v1777_v39  ;;  %v3617_v9 = vadd.f32 %v1783_v4, %v1779_v3 }
 0x2fb   : > { %v1628_v45 = vmul.f32 %v1586_v14, %v3595_v12  ;;  %v1644_v30 = vmul.f32 %v1586_v14, %v3591_v25  ;;  %v1611_v53 = vmul.f32 %v3387_v17, %v1586_v14  ;;  %v1793_v18 = vmul.f32 %v3554_v33, %v3428_v55 }
 0x2fc   : > { %v1632_v31 = vmul.f32 %v1598_v29, %v3591_v25  ;;  %v1640_v26 = vmul.f32 %v1598_v29, %v3595_v12  ;;  %v1124_v49 = vsel %vm1041_vm6, %v1123_v22, %v1122_v48  ;;  %v1620_v8 = vmul.f32 %v3456_v35, %v1598_v29 }
 0x2fd   : > { %v1127_v42 = vsel %vm3476_vm7, %v3030_v10, %v1124_v49  ;;  %v1615_v62 = vadd.f32 %v1611_v53, %v1578_v58  ;;  %v1795_v13 = vmul.f32 %v3556_v27, %v3326_v56  ;;  %v1797_v33 = vsub.f32 %v1789_v47, %v1793_v18 }
 0x2fe   : > { %v1636_v11 = vadd.f32 %v1632_v31, %v1628_v45  ;;  %v1648_v44 = vsub.f32 %v1640_v26, %v1644_v30  ;;  %2487 = vcosq.f32 %v1127_v42  ;;  %v3637_v39 = vstv %s1804_s5  ;;  %s1951_s5 = sadd.s32 8, %s2973_s11  ;;  %s3832_s11 = sld [smem:[#allocation4 + %s1955_s18]] }
 0x2ff   : > { %2489 = vsinq.f32 %v1127_v42  ;;  %v1624_v3 = vadd.f32 %v1620_v8, %v1615_v62  ;;  %v1799_v41 = vsub.f32 %v1791_v38, %v1795_v13  ;;  %v1810_v1 = vmul.f32 %v3637_v39, %v3615_v0 }
 0x300   : > { %v1678_v16 = vmul.f32 %v1636_v11, %v3595_v12  ;;  %v1682_v60 = vmul.f32 %v1648_v44, %v3591_v25  ;;  %v1690_v27 = vmul.f32 %v1648_v44, %v3595_v12  ;;  %v1694_v19 = vmul.f32 %v1636_v11, %v3591_v25 }
 0x301   : > { %v1661_v37 = vmul.f32 %v3459_v61, %v1636_v11  ;;  %v1670_v48 = vmul.f32 %v3501_v34, %v1648_v44  ;;  %v1812_v43 = vmul.f32 %v3637_v39, %v3617_v9  ;;  %v1814_v4 = vadd.f32 %v1810_v1, %v1773_v6 }
 0x302   : > { %v1686_v58 = vadd.f32 %v1682_v60, %v1678_v16  ;;  %v1698_v14 = vsub.f32 %v1690_v27, %v1694_v19  ;;  %v3650_v47 = vstv %s1808_s13  ;;  %v1827_v38 = vmul.f32 %v3615_v0, %v3432_v40  ;;  %s3827_s13 = sld [smem:[#allocation4 + %s1951_s5]] }
 0x303   : > { %v1665_v29 = vadd.f32 %v1661_v37, %v1624_v3  ;;  %v1816_v22 = vadd.f32 %v1812_v43, %v1775_v7  ;;  %v1819_v45 = vmul.f32 %v3650_v47, %v1797_v33  ;;  %v1821_v30 = vmul.f32 %v3650_v47, %v1799_v41 }
 0x304   : > { %v1711_v53 = vmul.f32 %v3530_v24, %v1686_v58  ;;  %v1720_v18 = vmul.f32 %v3534_v59, %v1698_v14  ;;  %v1728_v6 = vmul.f32 %v1686_v58, %v3595_v12  ;;  %v1732_v31 = vmul.f32 %v1698_v14, %v3591_v25  ;;  %s1957_s25 = scvt.s32.f32 %s3832_s11 }
 0x305   : > { %vm1138_vm14 = vcmp.eq.s32.totalorder %v3521_v36, 2  ;;  %vm1550_vm15 = vcmp.eq.s32.totalorder %v3523_v57, 2  ;;  %v1674_v7 = vadd.f32 %v1670_v48, %v1665_v29  ;;  %v1740_v26 = vmul.f32 %v1698_v14, %v3595_v12 }
 0x306   : > { %v1744_v49 = vmul.f32 %v1686_v58, %v3591_v25  ;;  %v3667_v8 = vadd.f32 %v1819_v45, %v1814_v4  ;;  %vm1135_vm0 = vcmp.eq.s32.totalorder %v3521_v36, 0  ;;  %vm1547_vm1 = vcmp.eq.s32.totalorder %v3523_v57, 0 }
 0x307   : > { %v1736_v42 = vadd.f32 %v1732_v31, %v1728_v6  ;;  %v3671_v62 = vadd.f32 %v1821_v30, %v1816_v22  ;;  %v1829_v13 = vmul.f32 %v3617_v9, %v3330_v21  ;;  %v1831_v11 = vmul.f32 %v1797_v33, %v3428_v55 }
 0x308   : > { %vm1134_vm3 = vcmp.lt.s32.totalorder %v3521_v36, 2  ;;  %vm1546_vm4 = vcmp.lt.s32.totalorder %v3523_v57, 2  ;;  %v1715_v44 = vadd.f32 %v1711_v53, %v1674_v7  ;;  %v1748_v3 = vsub.f32 %v1740_v26, %v1744_v49  ;;  %s1953_s20 = scvt.s32.f32 %s3827_s13 }
 0x309   : > { %v1833_v1 = vmul.f32 %v1799_v41, %v3326_v56  ;;  %v1839_v16 = vmul.f32 %v1797_v33, %v3432_v40  ;;  %vm1131_vm6 = vweird.f32 %v3030_v10  ;;  %v1761_v60 = vmul.f32 %v3562_v23, %v1736_v42 }
 0x30a   : > { %v1778_v27 = vmul.f32 %v1736_v42, %v3595_v12  ;;  %v1794_v19 = vmul.f32 %v1736_v42, %v3591_v25  ;;  %v3684_v37 = vadd.f32 %v1831_v11, %v1827_v38  ;;  %v1724_v48 = vadd.f32 %v1720_v18, %v1715_v44  ;;  %s1954_s26 = smul.f32 9.313226e-10, %s1953_s20 }
 0x30b   : > { %v1770_v43 = vmul.f32 %v3569_v63, %v1748_v3  ;;  %v1782_v4 = vmul.f32 %v1748_v3, %v3591_v25  ;;  %v1790_v58 = vmul.f32 %v1748_v3, %v3595_v12  ;;  %v3689_v33 = vadd.f32 %v1833_v1, %v1829_v13  ;;  %v2488_v38 = vpop.eup %2487 }
 0x30c   : > { %v1841_v14 = vmul.f32 %v1799_v41, %v3330_v21  ;;  %v1843_v29 = vmul.f32 %v3615_v0, %v3428_v55  ;;  %v1845_v22 = vmul.f32 %v3617_v9, %v3326_v56  ;;  %v1765_v45 = vadd.f32 %v1761_v60, %v1724_v48  ;;  %v2490_v6 = vpop.eup %2489 }
 0x30d   : > { %v1786_v30 = vadd.f32 %v1782_v4, %v1778_v27  ;;  %v1798_v53 = vsub.f32 %v1790_v58, %v1794_v19  ;;  %v3696_v18 = vstv %s1854_s27  ;;  %v1139_v31 = vxor.u32 2147483648, %v2488_v38  ;;  %s1958_s27 = smul.f32 9.313226e-10, %s1957_s25 }
 0x30e   : > { %v3698_v7 = vsub.f32 %v1839_v16, %v1843_v29  ;;  %v3700_v26 = vsub.f32 %v1841_v14, %v1845_v22  ;;  %v1860_v0 = vmul.f32 %v3696_v18, %v3684_v37  ;;  %v1136_v41 = vxor.u32 2147483648, %v2490_v6 }
 0x30f   : > { %v1774_v49 = vadd.f32 %v1770_v43, %v1765_v45  ;;  %v1811_v9 = vmul.f32 %v3637_v39, %v1786_v30  ;;  %v1820_v42 = vmul.f32 %v3650_v47, %v1798_v53  ;;  %v1140_v13 = vsel %vm1138_vm14, %v1139_v31, %v2490_v6 }
 0x310   : > { %v1552_v11 = vsel %vm1550_vm15, %v1139_v31, %v2490_v6  ;;  %v1828_v44 = vmul.f32 %v1786_v30, %v3595_v12  ;;  %v1832_v3 = vmul.f32 %v1798_v53, %v3591_v25  ;;  %v1137_v1 = vsel %vm1135_vm0, %v2488_v38, %v1136_v41 }
 0x311   : > { %v1549_v16 = vsel %vm1547_vm1, %v2488_v38, %v1136_v41  ;;  %v1815_v60 = vadd.f32 %v1811_v9, %v1774_v49  ;;  %v1840_v27 = vmul.f32 %v1798_v53, %v3595_v12  ;;  %v1141_v19 = vsel %vm1134_vm3, %v1137_v1, %v1140_v13 }
 0x312   : > { %v1553_v48 = vsel %vm1546_vm4, %v1549_v16, %v1552_v11  ;;  %v3723_v43 = vadd.f32 %v1832_v3, %v1828_v44  ;;  %v1844_v4 = vmul.f32 %v1786_v30, %v3591_v25  ;;  %v3728_v58 = vsel %vm1131_vm6, nan, %v1141_v19 }
 0x313   : > { %v3732_v14 = vsel %vm1131_vm6, nan, %v1553_v48  ;;  %v1824_v29 = vadd.f32 %v1820_v42, %v1815_v60  ;;  %v1862_v36 = vmul.f32 %v3696_v18, %v3689_v33  ;;  %v1567_v57 = vmul.f32 %v3135_v2, %v3728_v58 }
 0x314   : > { %v1576_v22 = vmul.f32 %v3139_v5, %v3732_v14  ;;  %v1584_v38 = vmul.f32 %v3732_v14, %v3728_v58  ;;  %v1592_v10 = vmul.f32 %v3732_v14, %v3732_v14  ;;  %v1596_v45 = vmul.f32 %v3728_v58, %v3728_v58 }
 0x315   : > { %v1848_v30 = vsub.f32 %v1840_v27, %v1844_v4  ;;  %v1861_v53 = vmul.f32 %v3696_v18, %v3723_v43  ;;  %v1864_v6 = vadd.f32 %v1860_v0, %v3667_v8  ;;  %v1866_v5 = vadd.f32 %v1862_v36, %v3671_v62 }
 0x316   : > { %v1580_v2 = vadd.f32 %v1576_v22, %v1567_v57  ;;  %v1588_v31 = vadd.f32 %v1584_v38, %v1584_v38  ;;  %v3753_v41 = vstv %s1858_s24  ;;  %v1600_v49 = vsub.f32 %v1592_v10, %v1596_v45 }
 0x317   : > { %v1865_v9 = vadd.f32 %v1861_v53, %v1824_v29  ;;  %v1869_v42 = vmul.f32 %v3753_v41, %v3698_v7  ;;  %v1870_v13 = vmul.f32 %v3753_v41, %v1848_v30  ;;  %v1871_v62 = vmul.f32 %v3753_v41, %v3700_v26 }
 0x318   : > { %v1630_v11 = vmul.f32 %v1588_v31, %v3732_v14  ;;  %v1646_v8 = vmul.f32 %v1588_v31, %v3728_v58  ;;  %v1613_v0 = vmul.f32 %v3387_v17, %v1588_v31  ;;  %v1634_v44 = vmul.f32 %v1600_v49, %v3728_v58 }
 0x319   : > { %v1642_v3 = vmul.f32 %v1600_v49, %v3732_v14  ;;  %v1622_v1 = vmul.f32 %v3456_v35, %v1600_v49  ;;  %v3768_v16 = vadd.f32 %v1869_v42, %v1864_v6  ;;  %v3770_v27 = vadd.f32 %v1870_v13, %v1865_v9 }
 0x31a   : > { %v1617_v60 = vadd.f32 %v1613_v0, %v1580_v2  ;;  %v3772_v19 = vadd.f32 %v1871_v62, %v1866_v5  ;;  %v1877_v48 = vmul.f32 %v3684_v37, %v3432_v40  ;;  %v1638_v17 = vadd.f32 %v1634_v44, %v1630_v11 }
 0x31b   : > { %v1650_v4 = vsub.f32 %v1642_v3, %v1646_v8  ;;  %v1878_v29 = vmul.f32 %v3723_v43, %v3595_v12  ;;  %v1879_v36 = vmul.f32 %v3689_v33, %v3330_v21  ;;  %v1881_v57 = vmul.f32 %v3698_v7, %v3428_v55 }
 0x31c   : > { %v1626_v35 = vadd.f32 %v1622_v1, %v1617_v60  ;;  %v1882_v22 = vmul.f32 %v1848_v30, %v3591_v25  ;;  %v1883_v38 = vmul.f32 %v3700_v26, %v3326_v56  ;;  %v1680_v10 = vmul.f32 %v1638_v17, %v3732_v14 }
 0x31d   : > { %v1684_v45 = vmul.f32 %v1650_v4, %v3728_v58  ;;  %v1692_v53 = vmul.f32 %v1650_v4, %v3732_v14  ;;  %v1696_v6 = vmul.f32 %v1638_v17, %v3728_v58  ;;  %v1663_v2 = vmul.f32 %v3459_v61, %v1638_v17 }
 0x31e   : > { %v1672_v31 = vmul.f32 %v3501_v34, %v1650_v4  ;;  %v3792_v5 = vadd.f32 %v1881_v57, %v1877_v48  ;;  %v3794_v49 = vadd.f32 %v1882_v22, %v1878_v29  ;;  %v3796_v13 = vadd.f32 %v1883_v38, %v1879_v36 }
 0x31f   : > { %v1688_v9 = vadd.f32 %v1684_v45, %v1680_v10  ;;  %v1700_v42 = vsub.f32 %v1692_v53, %v1696_v6  ;;  %v1889_v11 = vmul.f32 %v3698_v7, %v3432_v40  ;;  %v1667_v8 = vadd.f32 %v1663_v2, %v1626_v35 }
 0x320   : > { %v1890_v0 = vmul.f32 %v1848_v30, %v3595_v12  ;;  %v1891_v61 = vmul.f32 %v3700_v26, %v3330_v21  ;;  %v1893_v34 = vmul.f32 %v3684_v37, %v3428_v55  ;;  %v1894_v26 = vmul.f32 %v3723_v43, %v3591_v25 }
 0x321   : > { %v1713_v62 = vmul.f32 %v3530_v24, %v1688_v9  ;;  %v1722_v44 = vmul.f32 %v3534_v59, %v1700_v42  ;;  %v1730_v3 = vmul.f32 %v1688_v9, %v3732_v14  ;;  %v1734_v7 = vmul.f32 %v1700_v42, %v3728_v58 }
 0x322   : > { %v1676_v1 = vadd.f32 %v1672_v31, %v1667_v8  ;;  %v1742_v60 = vmul.f32 %v1700_v42, %v3732_v14  ;;  %v1746_v30 = vmul.f32 %v1688_v9, %v3728_v58  ;;  %v1895_v37 = vmul.f32 %v3689_v33, %v3326_v56 }
 0x323   : > { %v1738_v48 = vadd.f32 %v1734_v7, %v1730_v3  ;;  %v3817_v24 = vsub.f32 %v1889_v11, %v1893_v34  ;;  %v3819_v59 = vstv %s1904_s23  ;;  %v1898_v29 = vsub.f32 %v1890_v0, %v1894_v26  ;;  %s2637_s23 = scalar_lea.vmem %s2636_s21, 1024 }
 0x324   : > { %v1717_v17 = vadd.f32 %v1713_v62, %v1676_v1  ;;  %v1750_v4 = vsub.f32 %v1742_v60, %v1746_v30  ;;  %v1910_v36 = vmul.f32 %v3819_v59, %v3792_v5  ;;  %v1899_v22 = vsub.f32 %v1891_v61, %v1895_v37  ;;  %p2639_p1 = scmp.lt.s32.totalorder %s2637_s23, %s2631_s4 }
 0x325   : > { %v1763_v35 = vmul.f32 %v3562_v23, %v1738_v48  ;;  %v1780_v43 = vmul.f32 %v1738_v48, %v3732_v14  ;;  %v1796_v57 = vmul.f32 %v1738_v48, %v3728_v58  ;;  %v1911_v53 = vmul.f32 %v3819_v59, %v3794_v49 }
 0x326   : > { %v1726_v33 = vadd.f32 %v1722_v44, %v1717_v17  ;;  %v1772_v38 = vmul.f32 %v3569_v63, %v1750_v4  ;;  %v1784_v10 = vmul.f32 %v1750_v4, %v3728_v58  ;;  %v1792_v45 = vmul.f32 %v1750_v4, %v3732_v14  ;;  %p2640_p6 = por %p2639_p1, %p2638_p7 }
 0x327   : > { %v1912_v23 = vmul.f32 %v3819_v59, %v3796_v13  ;;  %v1914_v6 = vadd.f32 %v1910_v36, %v3768_v16  ;;  %v1918_v2 = vstv %s1908_s15  ;;  %v1915_v11 = vadd.f32 %v1911_v53, %v3770_v27 }
 0x328   : > { %v1767_v31 = vadd.f32 %v1763_v35, %v1726_v33  ;;  %v1788_v9 = vadd.f32 %v1784_v10, %v1780_v43  ;;  %v1800_v42 = vsub.f32 %v1792_v45, %v1796_v57  ;;  %v1919_v63 = vmul.f32 %v1918_v2, %v3817_v24  ;;  %p2641_p11 = pnand %p2640_p6, %p2634_p3 }
 0x329   : > { %v1916_v8 = vadd.f32 %v1912_v23, %v3772_v19  ;;  %v1920_v0 = vmul.f32 %v1918_v2, %v1898_v29  ;;  %v1921_v61 = vmul.f32 %v1918_v2, %v1899_v22  ;;  %v1927_v26 = vmul.f32 %v3792_v5, %v3432_v40 }
 0x32a   : > { %v1776_v34 = vadd.f32 %v1772_v38, %v1767_v31  ;;  %v1813_v62 = vmul.f32 %v3637_v39, %v1788_v9  ;;  %v1822_v44 = vmul.f32 %v3650_v47, %v1800_v42  ;;  %v1830_v16 = vmul.f32 %v1788_v9, %v3732_v14 }
 0x32b   : > { %v1834_v3 = vmul.f32 %v1800_v42, %v3728_v58  ;;  %v1842_v7 = vmul.f32 %v1800_v42, %v3732_v14  ;;  %v1846_v1 = vmul.f32 %v1788_v9, %v3728_v58  ;;  %v1923_v27 = vadd.f32 %v1919_v63, %v1914_v6 }
 0x32c   : > { %v1817_v60 = vadd.f32 %v1813_v62, %v1776_v34  ;;  %v1924_v19 = vadd.f32 %v1920_v0, %v1915_v11  ;;  %v1925_v30 = vadd.f32 %v1921_v61, %v1916_v8  ;;  %v1928_v47 = vmul.f32 %v3794_v49, %v3595_v12 }
 0x32d   : > { %v1838_v48 = vadd.f32 %v1834_v3, %v1830_v16  ;;  %v1850_v39 = vsub.f32 %v1842_v7, %v1846_v1  ;;  %v1929_v37 = vmul.f32 %v3796_v13, %v3330_v21  ;;  %v1931_v4 = vmul.f32 %v3817_v24, %v3428_v55 }
 0x32e   : > { %v1826_v17 = vadd.f32 %v1822_v44, %v1817_v60  ;;  %v1932_v36 = vmul.f32 %v1898_v29, %v3591_v25  ;;  %v1933_v35 = vmul.f32 %v1899_v22, %v3326_v56  ;;  %v1939_v42 = vmul.f32 %v3817_v24, %v3432_v40  ;;  %v1979_v60 = vld [vmem:[%s2940_s19 + $0x10] sm:$0xff] }
 0x32f   : > { %v1863_v43 = vmul.f32 %v3696_v18, %v1838_v48  ;;  %v1872_v57 = vmul.f32 %v3753_v41, %v1850_v39  ;;  %v1880_v33 = vmul.f32 %v1838_v48, %v3732_v14  ;;  %v1884_v38 = vmul.f32 %v1850_v39, %v3728_v58 }
 0x330   : > { %v1892_v10 = vmul.f32 %v1850_v39, %v3732_v14  ;;  %v1896_v45 = vmul.f32 %v1838_v48, %v3728_v58  ;;  %v1935_v53 = vadd.f32 %v1931_v4, %v1927_v26  ;;  %v1936_v23 = vadd.f32 %v1932_v36, %v1928_v47  ;;  %v1980_v26 = vld [vmem:[%s2940_s19 + $0x18] sm:$0xff] }
 0x331   : > { %v1867_v6 = vadd.f32 %v1863_v43, %v1826_v17  ;;  %v1888_v31 = vadd.f32 %v1884_v38, %v1880_v33  ;;  %v1937_v9 = vadd.f32 %v1933_v35, %v1929_v37  ;;  %v1940_v41 = vmul.f32 %v1898_v29, %v3595_v12 }
 0x332   : > { %v1900_v18 = vsub.f32 %v1892_v10, %v1896_v45  ;;  %v1941_v63 = vmul.f32 %v1899_v22, %v3330_v21  ;;  %v1943_v11 = vmul.f32 %v3792_v5, %v3428_v55  ;;  %v1944_v34 = vmul.f32 %v3794_v49, %v3591_v25 }
 0x333   : > { %v1876_v8 = vadd.f32 %v1872_v57, %v1867_v6  ;;  %v1913_v0 = vmul.f32 %v3819_v59, %v1888_v31  ;;  %v1930_v61 = vmul.f32 %v1888_v31, %v3732_v14  ;;  %v1945_v21 = vmul.f32 %v3796_v13, %v3326_v56  ;;  %v1978_v56 = vld [vmem:[%s2940_s19 + $0x8] sm:$0xff] }
 0x334   : > { %v1922_v62 = vmul.f32 %v1918_v2, %v1900_v18  ;;  %v1934_v40 = vmul.f32 %v1900_v18, %v3728_v58  ;;  %v1942_v12 = vmul.f32 %v1900_v18, %v3732_v14  ;;  %v1946_v5 = vmul.f32 %v1888_v31, %v3728_v58  ;;  %v1977_v14 = vld [vmem:[%s2940_s19] sm:$0xff]  ;;  %s2258_s19 = sshll.u32 %s2717_s8, 9  ;;  %s2034_s8 = scalar_lea.sflag [#allocation7], %s2927_s2 }
 0x335   : > { %v1917_v55 = vadd.f32 %v1913_v0, %v1876_v8  ;;  %v1947_v24 = vsub.f32 %v1939_v42, %v1943_v11  ;;  %v1948_v59 = vsub.f32 %v1940_v41, %v1944_v34  ;;  %v1949_v22 = vsub.f32 %v1941_v63, %v1945_v21  ;;  %s3899_s16 = scalar_lea.hbm %s3954_s6, %s2258_s19 }
 0x336   : > { %v1938_v29 = vadd.f32 %v1934_v40, %v1930_v61  ;;  %v1959_v25 = vstv %s1954_s26  ;;  %v1968_v49 = vstv %s1958_s27  ;;  %v1950_v44 = vsub.f32 %v1942_v12, %v1946_v5 }
 0x337   : > { %v1926_v2 = vadd.f32 %v1922_v62, %v1917_v55  ;;  %v1960_v16 = vmul.f32 %v1959_v25, %v1935_v53  ;;  %v1961_v3 = vmul.f32 %v1959_v25, %v1936_v23  ;;  %v2008_v7 = vadd.f32 %v3118_v54, %v3113_v51 }
 0x338   : > { %v2010_v13 = vmul.f32 0.1, %v3092_v20  ;;  %v1962_v58 = vmul.f32 %v1959_v25, %v1937_v9  ;;  %v1963_v1 = vmul.f32 %v1959_v25, %v1938_v29  ;;  %v1969_v47 = vmul.f32 %v1968_v49, %v1947_v24 }
 0x339   : > { %v1964_v48 = vadd.f32 %v1960_v16, %v1923_v27  ;;  %v1965_v39 = vadd.f32 %v1961_v3, %v1924_v19  ;;  %v1970_v37 = vmul.f32 %v1968_v49, %v1948_v59  ;;  %v1971_v36 = vmul.f32 %v1968_v49, %v1949_v22 }
 0x33a   : > { %v1966_v17 = vadd.f32 %v1962_v58, %v1925_v30  ;;  %v1967_v4 = vadd.f32 %v1963_v1, %v1926_v2  ;;  %v1972_v35 = vmul.f32 %v1968_v49, %v1950_v44  ;;  %v2017_v43 = vmul.f32 %v3111_v50, %v1977_v14 }
 0x33b   : > { %v2018_v57 = vmul.f32 %v3510_v32, %v1978_v56  ;;  %v1973_v51 = vadd.f32 %v1969_v47, %v1964_v48  ;;  %v1974_v54 = vadd.f32 %v1970_v37, %v1965_v39  ;;  %v2019_v20 = vmul.f32 %v3106_v46, %v1979_v60 }
 0x33c   : > { %v2020_v33 = vmul.f32 %v2008_v7, %v1980_v26  ;;  %v1975_v38 = vadd.f32 %v1971_v36, %v1966_v17  ;;  %v1976_v27 = vadd.f32 %v1972_v35, %v1967_v4 }
 0x33d   : > { %v2013_v19 = vmul.f32 %v3083_v28, %v1973_v51  ;;  %v2014_v10 = vmul.f32 %v2010_v13, %v1974_v54 }
 0x33e   : > { %v2015_v30 = vmul.f32 %v2993_v15, %v1975_v38  ;;  %v2016_v45 = vmul.f32 %v3115_v52, %v1976_v27 }
 0x33f   : > { %v2021_v53 = vadd.f32 %v2017_v43, %v2013_v19  ;;  %v2022_v50 = vadd.f32 %v2018_v57, %v2014_v10 }
 0x340   : > { %v2023_v23 = vadd.f32 %v2019_v20, %v2015_v30  ;;  %v2024_v32 = vadd.f32 %v2020_v33, %v2016_v45 }
 0x341   : > { %2491 = vtanh.f32 %v2021_v53 }
 0x342   : > { %2493 = vtanh.f32 %v2022_v50 }
 0x343   : > { %2495 = vtanh.f32 %v2023_v23 }
 0x344   : > { %2497 = vtanh.f32 %v2024_v32 }
 0x34e   : > { %v2492_v46 = vpop.eup %2491 }
 0x34f   : > { %v2494_v28 = vpop.eup %2493  ;;  %2029 = vst [vmem:[%s318_s22] sm:$0xff] %v2492_v46 }
 0x350   : > { %v2496_v15 = vpop.eup %2495  ;;  %2030 = vst [vmem:[%s318_s22 + $0x8] sm:$0xff] %v2494_v28 }
 0x351   : > { %v2498_v52 = vpop.eup %2497  ;;  %2031 = vst [vmem:[%s318_s22 + $0x10] sm:$0xff] %v2496_v15 }
 0x352   : > { %2032 = vst [vmem:[%s318_s22 + $0x18] sm:$0xff] %v2498_v52 }
 0x353   : > { %2644 = shalt.err (!%p2641_p11)
}
 0x354   : > { %s2645_s29 = scalar_lea.hbm %s3899_s16, 512  ;;  %s2649_s18 = scalar_lea.hbm %s3954_s6, 1024 }
 0x355   : > { %p2646_p12 = scmp.ne.s32.totalorder %s3899_s16, %s2645_s29  ;;  %p2650_p9 = scmp.lt.s32.totalorder %s3899_s16, %s3954_s6 }
 0x356   : > { %p2651_p10 = scmp.lt.s32.totalorder %s2649_s18, %s2645_s29 }
 0x357   : > { %p2647_p2 = pnand %p2646_p12, %p2880_p5 }
 0x358   : > { %p2652_p8 = por %p2651_p10, %p2650_p9 }
 0x359   : > { %p2648_p4 = pneg %p2647_p2 }
 0x35b   : > { %p2653_p0 = pnand %p2652_p8, %p2648_p4 }
 0x35d   : > { %2656 = shalt.err (!%p2653_p0)
}
 0x35e   : > { %s2746_s20 = smov 128   ;;  %s2747_s25 = smov 8  }
 0x35f   : > { %2371 = dma.vmem_to_hbm [thread:$0]  (%p2880_p5), %s3901_s17, 512, %s3899_s16, %s2034_s8, %s2746_s20, %s2746_s20, %s2747_s25  }
 0x360 PF: > { %s2064_s26 = sand.u32 1, %s2705_s1   ;;  %p3985_p13 = scmp.ne.s32.totalorder %s3962_s14, 0 }
 0x361   : > { %p3986_p3 = scmp.ge.s32.totalorder %s2725_s10, 2  ;;  %s2065_s27 = scalar_lea.sflag [#allocation7], %s2064_s26 }
 0x363   : > { %p2388_p7 = pnand %p3986_p3, %p3985_p13 }
 0x365   : > { %p2389_p1 = pneg %p2388_p7 }
 0x367   : > { %2700 = dma.done.wait (%p2389_p1), %s2065_s27, 512  }
 0x368   : > { %2702 = vsyncadd (%p2389_p1), %s2065_s27, 4294966784  ;;  %s36_s10 = sadd.s32 1, %s2725_s10   ;;  %s3987_s12 = sld [smem:[#allocation21_spill]] }
 0x369   : > { %p33_p6 = scmp.ge.s32.totalorder %s36_s10, 4   ;;  %s3988_s2 = sld [smem:[#allocation20_spill]] }
 0x36a   : > { %s3989_s1 = smov %s2709_s30  ;;  %s3990_s30 = smov %s2713_s7 }
 0x36b   : > { %s3992_s8 = smov %s2721_s9  ;;  %35 = sbr.rel (!%p33_p6) target bundleno = 36 (0x24), region = 102 }
 0x36e   : > { %s3991_s7 = smov %s3987_s12 }
 0x36f   : > { %s3993_s9 = smov %s3988_s2 }
 0x370   :  { %2070 = vsyncpa [#allocation6], 1 }
 0x371   :  { %2072 = vsyncpa [#allocation6 + $0x1], 1 }
 0x372   :  { %2073 = vsyncpa [#allocation9], 1 }
 0x373   :  { %2075 = vsyncpa [#allocation9 + $0x1], 1 }
 0x374   :  { %2076 = vsyncpa [#allocation12], 1 }
 0x375   :  { %2077 = vsyncpa [#allocation7], 1 }
 0x376   :  { %2079 = vsyncpa [#allocation7 + $0x1], 1 }

</bundles_post_ra>
